<compile_context>
chip_gen: v6e
topology: v6e:2x2x1
jax: 0.10.0
libtpu: 0.0.40
codegen_flags: <defaults>
</compile_context>

<pallas_src>
import functools

import jax
import jax.numpy as jnp
from jax.experimental import pallas as pl
from jax.experimental.pallas import tpu as pltpu

EPS = 1e-5


def _fused_kernel(x30_ref, w10_ref, b10_ref, w11_ref, gamma_ref, beta_ref,
                  x27_ref, x21_ref, out_ref, *, inv_n, mxu_dtype):
    """One grid step = one tile of conv11 *output* channels.

    BN stats are per output channel over HW, so tiles are independent:
    no cross-step scratch, no second phase, grid axis is safely 'parallel'.
    """
    # SE gate over conv11's input channels: sigmoid((1,Cse)@(Cse,C) + b).
    # Tiny; recomputed every step so the grid axis carries no state.
    x31 = jnp.dot(x30_ref[...], w10_ref[...],
                  preferred_element_type=jnp.float32) + b10_ref[...]
    gate = jax.nn.sigmoid(x31)                                       # (1, Cin)

    # Fold the gate into this tile of conv11's weight: scales the input-channel
    # columns via a sublane-broadcast row multiply (no transpose needed).
    w11s = (w11_ref[...].astype(jnp.float32) * gate).astype(mxu_dtype)

    x27_op = x27_ref[...]
    if x27_op.dtype != mxu_dtype:
        x27_op = x27_op.astype(mxu_dtype)

    # conv2d11 (1x1, bias-free) for this output-channel tile: one MXU matmul,
    # f32 accumulation.  x34 stays in VMEM; it is never recomputed/re-streamed.
    x34 = jnp.dot(w11s, x27_op, preferred_element_type=jnp.float32)  # (T, HW)

    # BatchNorm (training mode): exact two-pass per-channel mean / variance.
    mean = jnp.sum(x34, axis=1, keepdims=True) * inv_n               # (T, 1)
    centered = x34 - mean
    var = jnp.sum(centered * centered, axis=1, keepdims=True) * inv_n
    scale = gamma_ref[...] * jax.lax.rsqrt(var + EPS)                # (T, 1)

    # Normalize, add affine shift and the x21 residual, store.
    out_ref[...] = (centered * scale + beta_ref[...]
                    + x21_ref[...].astype(jnp.float32)).astype(out_ref.dtype)


@functools.partial(jax.jit, static_argnames=("tile_c", "io_dtype", "mxu_dtype"))
def fused_forward(x30, x27, x21, w10, b10, w11, gamma, beta,
                  *, tile_c=128, io_dtype=None, mxu_dtype=None):
    """NCHW-in / NCHW-out fused forward of module M.

    x30: (1, C_se, 1, 1); x27, x21: (1, C, H, W)
    w10: (C, C_se, 1, 1); b10: (C,); w11: (C, C, 1, 1); gamma, beta: (C,)

    io_dtype:  dtype of the big slabs (x27/x21/w11/out) across the HBM boundary.
               Production recommendation: jnp.bfloat16 (halves HBM traffic).
    mxu_dtype: dtype fed to the MXU (accumulation is always f32).  Defaults to
               io_dtype; set jnp.bfloat16 to avoid multi-pass f32 matmuls even
               with f32 I/O.
    """
    n, c, h, w = x27.shape
    c_se = x30.shape[1]
    assert n == 1, "SE-gate folding assumes a single batch element (as in M)"
    assert c % 8 == 0, "channel count must be sublane-aligned"

    tile_c = min(tile_c, c)
    assert tile_c % 16 == 0 or tile_c == c, "tile_c must be packing-aligned"

    hw = h * w
    io_dtype = jnp.dtype(x27.dtype) if io_dtype is None else jnp.dtype(io_dtype)
    mxu_dtype = io_dtype if mxu_dtype is None else jnp.dtype(mxu_dtype)
    n_tiles = pl.cdiv(c, tile_c)

    # ---- layout plumbing: pure reshapes only for the big slabs (no transpose,
    # no pad -> no extra HBM round-trips outside the kernel). ----
    x27_k = x27.reshape(c, hw).astype(io_dtype)                    # (Cin,  HW)
    x21_k = x21.reshape(c, hw).astype(io_dtype)                    # (C,    HW)
    w11_k = w11.reshape(c, c).astype(io_dtype)                     # (Cout, Cin)
    x30_k = x30.reshape(1, c_se).astype(jnp.float32)               # (1, Cse)
    w10_k = jnp.transpose(w10.reshape(c, c_se)).astype(jnp.float32)  # (Cse, C) tiny
    b10_k = b10.reshape(1, c).astype(jnp.float32)                  # (1, C)
    gamma_k = gamma.reshape(c, 1).astype(jnp.float32)              # (C, 1)
    beta_k = beta.reshape(c, 1).astype(jnp.float32)                # (C, 1)

    def full(shape):                                  # constant block, fetched once
        return pl.BlockSpec(shape, lambda i: (0, 0))

    def ctile(shape):                                 # tiled over output channels
        return pl.BlockSpec(shape, lambda i: (i, 0))

    out_flat = pl.pallas_call(
        functools.partial(_fused_kernel, inv_n=1.0 / float(hw),
                          mxu_dtype=mxu_dtype),
        out_shape=jax.ShapeDtypeStruct((c, hw), io_dtype),
        grid=(n_tiles,),
        in_specs=[
            full((1, c_se)),            # x30
            full((c_se, c)),            # conv2d10 weight (Cse, C)
            full((1, c)),               # conv2d10 bias
            ctile((tile_c, c)),         # conv2d11 weight tile (Cout tile, Cin)
            ctile((tile_c, 1)),         # BN gamma
            ctile((tile_c, 1)),         # BN beta
            full((c, hw)),              # x27: VMEM-resident, streamed once per core
            ctile((tile_c, hw)),        # x21 residual tile
        ],
        out_specs=ctile((tile_c, hw)),
        compiler_params=pltpu.CompilerParams(
            # Channel tiles are independent -> v7x splits them across both TCs.
            dimension_semantics=("parallel",),
            # Full-HW resident x27 + tiles comfortably fit at the real 56x56
            # size; raise the scoped limit above the v5e 16 MiB default.
            vmem_limit_bytes=40 * 1024 * 1024,
        ),
    )(x30_k, w10_k, b10_k, w11_k, gamma_k, beta_k, x27_k, x21_k)

    return out_flat.reshape(1, c, h, w)


def reference_forward(x30, x27, x21, w10, b10, w11, gamma, beta, eps=EPS):
    """Pure-JAX NCHW reference matching the PyTorch module exactly."""
    x31 = jnp.einsum("oi,nihw->nohw", w10[:, :, 0, 0], x30) \
        + b10[None, :, None, None]
    x32 = jax.nn.sigmoid(x31)
    x33 = x32 * x27
    x34 = jnp.einsum("oi,nihw->nohw", w11[:, :, 0, 0], x33)
    mean = jnp.mean(x34, axis=(0, 2, 3), keepdims=True)
    var = jnp.mean((x34 - mean) ** 2, axis=(0, 2, 3), keepdims=True)
    x35 = (x34 - mean) * jax.lax.rsqrt(var + eps) * gamma[None, :, None, None] \
        + beta[None, :, None, None]
    return x21 + x35


if __name__ == "__main__":
    # Channel counts from the module __init__ (58 -> 232); spatial reduced
    # 56 -> 14 so the example is small but still exercises channel tiling
    # (grid of 2 tiles, second tile partial: 232 = 128 + 104).
    C_SE, C = 58, 232
    H = W = 14

    key = jax.random.PRNGKey(0)
    ks = jax.random.split(key, 8)

    x30 = jax.random.normal(ks[0], (1, C_SE, 1, 1), jnp.float32)
    x27 = jax.random.normal(ks[1], (1, C, H, W), jnp.float32)
    x21 = jax.random.normal(ks[2], (1, C, H, W), jnp.float32)

    w10 = 0.1 * jax.random.normal(ks[3], (C, C_SE, 1, 1), jnp.float32)   # conv2d10.weight
    b10 = 0.1 * jax.random.normal(ks[4], (C,), jnp.float32)              # conv2d10.bias
    w11 = 0.1 * jax.random.normal(ks[5], (C, C, 1, 1), jnp.float32)      # conv2d11.weight
    gamma = 1.0 + 0.1 * jax.random.normal(ks[6], (C,), jnp.float32)      # BN weight
    beta = 0.1 * jax.random.normal(ks[7], (C,), jnp.float32)             # BN bias

    ref = reference_forward(x30, x27, x21, w10, b10, w11, gamma, beta)

    # --- f32 I/O, f32 MXU: matches the PyTorch module's dtype exactly. ---
    out = jax.block_until_ready(
        fused_forward(x30, x27, x21, w10, b10, w11, gamma, beta))
    assert out.shape == (1, C, H, W)
    assert jnp.allclose(out, ref, atol=1e-3, rtol=1e-3), "f32 mismatch vs reference"

    # --- Production fast path: bf16 I/O (halved HBM bytes) + native bf16 MXU,
    #     f32 accumulation / BN statistics inside the kernel. ---
    out_bf = jax.block_until_ready(
        fused_forward(x30, x27, x21, w10, b10, w11, gamma, beta,
                      io_dtype=jnp.bfloat16))
    ref_bf = reference_forward(
        x30,
        x27.astype(jnp.bfloat16).astype(jnp.float32),
        x21.astype(jnp.bfloat16).astype(jnp.float32),
        w10, b10,
        w11.astype(jnp.bfloat16).astype(jnp.float32),
        gamma, beta)
    assert out_bf.dtype == jnp.bfloat16
    assert jnp.allclose(out_bf.astype(jnp.float32), ref_bf,
                        atol=5e-2, rtol=5e-2), "bf16 mismatch vs reference"

    # --- f32 I/O but bf16 MXU operands (review item: don't feed the MXU f32);
    #     looser tolerance because products are bf16-rounded. ---
    out_mx = jax.block_until_ready(
        fused_forward(x30, x27, x21, w10, b10, w11, gamma, beta,
                      mxu_dtype=jnp.bfloat16))
    assert jnp.allclose(out_mx, ref, atol=1e-1, rtol=1e-1), "bf16-MXU mismatch"

    print("KERNEL_OK")
</pallas_src>

<mosaic_0001>
module attributes {stable_mosaic.version = 11 : i64} {
  func.func @_fused_kernel(%arg0: i32, %arg1: memref<1x58xf32, #tpu.memory_space<vmem>>, %arg2: memref<58x232xf32, #tpu.memory_space<vmem>>, %arg3: memref<1x232xf32, #tpu.memory_space<vmem>>, %arg4: memref<128x232xf32, #tpu.memory_space<vmem>>, %arg5: memref<128x1xf32, #tpu.memory_space<vmem>>, %arg6: memref<128x1xf32, #tpu.memory_space<vmem>>, %arg7: memref<232x196xf32, #tpu.memory_space<vmem>>, %arg8: memref<128x196xf32, #tpu.memory_space<vmem>>, %arg9: memref<128x196xf32, #tpu.memory_space<vmem>>) attributes {dimension_semantics = [#tpu.dimension_semantics<parallel>], iteration_bounds = array<i64: 2>, scalar_prefetch = 0 : i64, scratch_operands = 0 : i64, tpu.core_type = #tpu.core_type<tc>, window_params = [{pipeline_mode = #tpu.pipeline_mode<synchronous>, transform_indices = @transform_0, window_bounds = array<i64: 1, 58>}, {pipeline_mode = #tpu.pipeline_mode<synchronous>, transform_indices = @transform_1, window_bounds = array<i64: 58, 232>}, {pipeline_mode = #tpu.pipeline_mode<synchronous>, transform_indices = @transform_2, window_bounds = array<i64: 1, 232>}, {transform_indices = @transform_3, window_bounds = array<i64: 128, 232>}, {transform_indices = @transform_4, window_bounds = array<i64: 128, 1>}, {transform_indices = @transform_5, window_bounds = array<i64: 128, 1>}, {pipeline_mode = #tpu.pipeline_mode<synchronous>, transform_indices = @transform_6, window_bounds = array<i64: 232, 196>}, {transform_indices = @transform_7, window_bounds = array<i64: 128, 196>}, {transform_indices = @transform_8, window_bounds = array<i64: 128, 196>}]} {
    %c0 = arith.constant 0 : index
    %c0_0 = arith.constant 0 : index
    %0 = vector.load %arg1[%c0, %c0_0] : memref<1x58xf32, #tpu.memory_space<vmem>>, vector<1x58xf32>
    %c0_1 = arith.constant 0 : index
    %c0_2 = arith.constant 0 : index
    %1 = vector.load %arg2[%c0_1, %c0_2] : memref<58x232xf32, #tpu.memory_space<vmem>>, vector<58x232xf32>
    %cst = arith.constant dense<0.000000e+00> : vector<1x232xf32>
    %2 = tpu.matmul %0, %1, %cst {dimension_numbers = #tpu.dot_dimension_numbers<[1], [0], [0], [1], [0, 0, 1, 1], [], []>} : vector<1x58xf32>, vector<58x232xf32>, vector<1x232xf32> -> vector<1x232xf32>
    %c0_3 = arith.constant 0 : index
    %c0_4 = arith.constant 0 : index
    %3 = vector.load %arg3[%c0_3, %c0_4] : memref<1x232xf32, #tpu.memory_space<vmem>>, vector<1x232xf32>
    %4 = arith.addf %2, %3 : vector<1x232xf32>
    %5 = arith.negf %4 : vector<1x232xf32>
    %6 = math.exp %5 : vector<1x232xf32>
    %cst_5 = arith.constant 1.000000e+00 : f32
    %7 = vector.broadcast %cst_5 : f32 to vector<1x232xf32>
    %8 = arith.addf %7, %6 : vector<1x232xf32>
    %9 = arith.divf %7, %8 : vector<1x232xf32>
    %c0_6 = arith.constant 0 : index
    %c0_7 = arith.constant 0 : index
    %10 = vector.load %arg4[%c0_6, %c0_7] : memref<128x232xf32, #tpu.memory_space<vmem>>, vector<128x232xf32>
    %11 = vector.broadcast %9 : vector<1x232xf32> to vector<128x232xf32>
    %12 = arith.mulf %10, %11 : vector<128x232xf32>
    %c0_8 = arith.constant 0 : index
    %c0_9 = arith.constant 0 : index
    %13 = vector.load %arg7[%c0_8, %c0_9] : memref<232x196xf32, #tpu.memory_space<vmem>>, vector<232x196xf32>
    %cst_10 = arith.constant dense<0.000000e+00> : vector<128x196xf32>
    %14 = tpu.matmul %12, %13, %cst_10 {dimension_numbers = #tpu.dot_dimension_numbers<[1], [0], [0], [1], [0, 0, 1, 1], [], []>} : vector<128x232xf32>, vector<232x196xf32>, vector<128x196xf32> -> vector<128x196xf32>
    %cst_11 = arith.constant dense<0.000000e+00> : vector<128xf32>
    %15 = vector.multi_reduction <add>, %14, %cst_11 [1] : vector<128x196xf32> to vector<128xf32>
    %16 = vector.shape_cast %15 : vector<128xf32> to vector<128x1xf32>
    %cst_12 = arith.constant 0.00510204071 : f32
    %17 = vector.broadcast %cst_12 : f32 to vector<128x1xf32>
    %18 = arith.mulf %16, %17 : vector<128x1xf32>
    %19 = vector.broadcast %18 : vector<128x1xf32> to vector<128x196xf32>
    %20 = arith.subf %14, %19 : vector<128x196xf32>
    %21 = arith.mulf %20, %20 : vector<128x196xf32>
    %cst_13 = arith.constant dense<0.000000e+00> : vector<128xf32>
    %22 = vector.multi_reduction <add>, %21, %cst_13 [1] : vector<128x196xf32> to vector<128xf32>
    %23 = vector.shape_cast %22 : vector<128xf32> to vector<128x1xf32>
    %cst_14 = arith.constant 0.00510204071 : f32
    %24 = vector.broadcast %cst_14 : f32 to vector<128x1xf32>
    %25 = arith.mulf %23, %24 : vector<128x1xf32>
    %c0_15 = arith.constant 0 : index
    %c0_16 = arith.constant 0 : index
    %26 = vector.load %arg5[%c0_15, %c0_16] : memref<128x1xf32, #tpu.memory_space<vmem>>, vector<128x1xf32>
    %cst_17 = arith.constant 9.99999974E-6 : f32
    %27 = vector.broadcast %cst_17 : f32 to vector<128x1xf32>
    %28 = arith.addf %25, %27 : vector<128x1xf32>
    %29 = math.rsqrt %28 : vector<128x1xf32>
    %30 = arith.mulf %26, %29 : vector<128x1xf32>
    %31 = vector.broadcast %30 : vector<128x1xf32> to vector<128x196xf32>
    %32 = arith.mulf %20, %31 : vector<128x196xf32>
    %c0_18 = arith.constant 0 : index
    %c0_19 = arith.constant 0 : index
    %33 = vector.load %arg6[%c0_18, %c0_19] : memref<128x1xf32, #tpu.memory_space<vmem>>, vector<128x1xf32>
    %34 = vector.broadcast %33 : vector<128x1xf32> to vector<128x196xf32>
    %35 = arith.addf %32, %34 : vector<128x196xf32>
    %c0_20 = arith.constant 0 : index
    %c0_21 = arith.constant 0 : index
    %36 = vector.load %arg8[%c0_20, %c0_21] : memref<128x196xf32, #tpu.memory_space<vmem>>, vector<128x196xf32>
    %37 = arith.addf %35, %36 : vector<128x196xf32>
    %c0_22 = arith.constant 0 : index
    %c0_23 = arith.constant 0 : index
    %38 = vector.load %arg9[%c0_22, %c0_23] : memref<128x196xf32, #tpu.memory_space<vmem>>, vector<128x196xf32>
    tpu.vector_store %arg9[%c0_22, %c0_23], %37 {strides = array<i32>} : memref<128x196xf32, #tpu.memory_space<vmem>>, vector<128x196xf32>,
    return
  }
  func.func @transform_0(%arg0: i32) -> (i32, i32) {
    %c0_i32 = arith.constant 0 : i32
    %c0_i32_0 = arith.constant 0 : i32
    %c0_i32_1 = arith.constant 0 : i32
    return %c0_i32, %c0_i32_0 : i32, i32
  }
  func.func @transform_1(%arg0: i32) -> (i32, i32) {
    %c0_i32 = arith.constant 0 : i32
    %c0_i32_0 = arith.constant 0 : i32
    %c0_i32_1 = arith.constant 0 : i32
    return %c0_i32, %c0_i32_0 : i32, i32
  }
  func.func @transform_2(%arg0: i32) -> (i32, i32) {
    %c0_i32 = arith.constant 0 : i32
    %c0_i32_0 = arith.constant 0 : i32
    %c0_i32_1 = arith.constant 0 : i32
    return %c0_i32, %c0_i32_0 : i32, i32
  }
  func.func @transform_3(%arg0: i32) -> (i32, i32) {
    %c0_i32 = arith.constant 0 : i32
    %c0_i32_0 = arith.constant 0 : i32
    return %arg0, %c0_i32 : i32, i32
  }
  func.func @transform_4(%arg0: i32) -> (i32, i32) {
    %c0_i32 = arith.constant 0 : i32
    %c0_i32_0 = arith.constant 0 : i32
    return %arg0, %c0_i32 : i32, i32
  }
  func.func @transform_5(%arg0: i32) -> (i32, i32) {
    %c0_i32 = arith.constant 0 : i32
    %c0_i32_0 = arith.constant 0 : i32
    return %arg0, %c0_i32 : i32, i32
  }
  func.func @transform_6(%arg0: i32) -> (i32, i32) {
    %c0_i32 = arith.constant 0 : i32
    %c0_i32_0 = arith.constant 0 : i32
    %c0_i32_1 = arith.constant 0 : i32
    return %c0_i32, %c0_i32_0 : i32, i32
  }
  func.func @transform_7(%arg0: i32) -> (i32, i32) {
    %c0_i32 = arith.constant 0 : i32
    %c0_i32_0 = arith.constant 0 : i32
    return %arg0, %c0_i32 : i32, i32
  }
  func.func @transform_8(%arg0: i32) -> (i32, i32) {
    %c0_i32 = arith.constant 0 : i32
    %c0_i32_0 = arith.constant 0 : i32
    return %arg0, %c0_i32 : i32, i32
  }
}

</mosaic_0001>

<bundles_post_ra>
// kernel: fused_forward.1
= control target key start
LH: loop header
LB: loop body
LE: loop exit
PB: predicated region body
PF: predicated region fallthrough
CT: control target
= control target key end

     0   :  { %s2201_s27 = smov 0   ;;  %s2203_s28 = smov 0   ;;  %s3197_s0 = inlined_call_operand.vmem [shape: f32[1,58], index: 0, kind: input, shape index: {}]   ;;  %s3198_s1 = inlined_call_operand.vmem [shape: f32[58,232], index: 1, kind: input, shape index: {}]   ;;  %s3199_s2 = inlined_call_operand.vmem [shape: f32[1,232], index: 2, kind: input, shape index: {}]   ;;  %s3200_s3 = inlined_call_operand.vmem [shape: f32[232,232], index: 3, kind: input, shape index: {}]   ;;  %s3201_s4 = inlined_call_operand.vmem [shape: f32[232,1], index: 4, kind: input, shape index: {}]   ;;  %s3202_s5 = inlined_call_operand.vmem [shape: f32[232,1], index: 5, kind: input, shape index: {}]   ;;  %s3203_s6 = inlined_call_operand.vmem [shape: f32[232,196], index: 6, kind: input, shape index: {}]   ;;  %s3204_s7 = inlined_call_operand.vmem [shape: f32[232,196], index: 7, kind: input, shape index: {}]   ;;  %s3205_s8 = inlined_call_operand.vmem [shape: f32[232,196], index: 8, kind: output, shape index: {}]  }
   0x1   :  { %s2205_s29 = smov 0  }
   0x2 LB: > { %s2214_s30 = sadd.s32 4294967295, %s2120_s29   ;;  %s2216_s9 = sadd.s32 1, %s2120_s29   ;;  %s2120_s29 = sphi %s2205_s29, %s3214_s29   ;;  %s2116_s28 = sphi %s2203_s28, %s3213_s28   ;;  %s2112_s27 = sphi %s2201_s27, %s3212_s27  }
   0x3   : > { %s210_s10 = ssub.s32 %s2120_s29, %s2216_s9  ;;  %s213_s11 = sadd.s32 1, %s2116_s28 }
   0x4   : > { %p211_p0 = scmp.eq.s32.totalorder %s210_s10, 0  ;;  %p223_p1 = scmp.ne.s32.totalorder %s2116_s28, %s2112_s27 }
   0x5   : > { %p224_p2 = scmp.eq.s32.totalorder %s2214_s30, 1  ;;  %p1817_p3 = scmp.ge.s32.totalorder %s2120_s29, 1 }
   0x6   : > { %s2224_s12 = scalar_select %p211_p0, %s2116_s28, %s213_s11  }
   0x7   : > { %p2226_p4 = por %p224_p2, %p223_p1  ;;  %p334_p5 = scmp.lt.s32.totalorder %s2120_s29, 3 }
   0x9   : > { %p335_p6 = pnand %p1817_p3, %p334_p5 }
   0xa   : > { %s2459_s22 = sshll.u32 (!%p335_p6), %s2214_s30, 4  ;;  %s399_s19 = sand.u32 (!%p335_p6), 1, %s2112_s27  }
   0xb   : > { %338 = sbr.rel (%p335_p6) target bundleno = 1049 (0x419), region = 52  ;;  %p408_p7 = scmp.lt.s32.totalorder (!%p335_p6), %s2459_s22, 28 }
   0xc   : > { %s1818_s26 = sshll.u32 (!%p335_p6), %s399_s19, 8 }
   0xd   : > { %s2928_s27 = scalar_lea.vmem (!%p335_p6), [#allocation2], %s1818_s26  }
  0x10   : > { %v486_v0 = vld [vmem:[%s3198_s1 + $0x78] sm:$0x3]  ;;  %vm503_vm0 = vcmask 1041408   ;;  %v485_v1 = vld [vmem:[%s3198_s1 + $0x70] sm:$0x3]  ;;  %v484_v2 = vld [vmem:[%s3198_s1 + $0x68] sm:$0xff] }
  0x11   : > { %1829 = vmatprep.subr.msk.mxu0 %vm503_vm0, %v486_v0  ;;  %v483_v3 = vld [vmem:[%s3198_s1 + $0x60] sm:$0xff]  ;;  %v482_v4 = vld [vmem:[%s3198_s1 + $0x58] sm:$0xff]  ;;  %v2154_v5 = vmov 0.0   ;;  %v481_v6 = vld [vmem:[%s3198_s1 + $0x50] sm:$0xff]  ;;  %vm499_vm1 = vcmask 474112   ;;  %s2463_s23 = scalar_select %p408_p7, %s2459_s22, 28 }
  0x12   : > { %1830 = vmatpush1.msk.msra.mxu0 %vm503_vm0, %v485_v1  ;;  %574 = vmatprep.mubr.f32.mxu0 %v2154_v5  ;;  %v480_v7 = vld [vmem:[%s3198_s1 + $0x48] sm:$0xff]  ;;  %v479_v8 = vld [vmem:[%s3198_s1 + $0x40] sm:$0xff]  ;;  %v478_v9 = vld [vmem:[%s3198_s1 + $0x38] sm:$0xff]  ;;  %vm723_vm2 = vcmask 850944   ;;  %vm933_vm3 = vcmask 556032  }
  0x13   : > { %528 = vmatprep.subr.mxu0 %v484_v2  ;;  %v696_v10 = vld [vmem:[%s3203_s6 + $0xf8] sm:$0xff]  ;;  %v695_v11 = vld [vmem:[%s3203_s6 + $0xf0] sm:$0xff]  ;;  %v694_v12 = vld [vmem:[%s3203_s6 + $0xe8] sm:$0xff]  ;;  %s1869_s24 = sshll.u32 %s2463_s23, 4  ;;  %s1823_s10 = sshll.u32 %s2463_s23, 3 }
  0x14   : > { %529 = vmatpush1.msra.mxu0 %v483_v3  ;;  %1876 = vmatprep.subr.mxu1 %v696_v10  ;;  %v693_v13 = vld [vmem:[%s3203_s6 + $0xe0] sm:$0xff]  ;;  %v477_v14 = vld [vmem:[%s3198_s1 + $0x30] sm:$0xff]  ;;  %v692_v15 = vld [vmem:[%s3203_s6 + $0xd8] sm:$0xff]  ;;  %s2471_s29 = scalar_lea.vmem %s3200_s3, %s1869_s24  ;;  %s2840_s15 = scalar_lea.vmem %s3202_s5, %s1823_s10 }
  0x15   : > { %530 = vmatprep.subr.mxu0 %v482_v4  ;;  %1905 = vmatpush1.msra.mxu1 %v695_v11  ;;  %v476_v16 = vld [vmem:[%s3198_s1 + $0x28] sm:$0xff]  ;;  %v691_v17 = vld [vmem:[%s3203_s6 + $0xd0] sm:$0xff]  ;;  %v475_v18 = vld [vmem:[%s3198_s1 + $0x20] sm:$0xff]  ;;  %s2872_s18 = scalar_lea.vmem %s3201_s4, %s1823_s10  ;;  %s2916_s25 = scalar_lea.vmem %s3204_s7, %s1869_s24 }
  0x16   : > { %531 = vmatpush1.msra.mxu0 %v481_v6  ;;  %1877 = vmatprep.subr.mxu1 %v694_v12  ;;  %v690_v19 = vld [vmem:[%s3203_s6 + $0xc8] sm:$0xff]  ;;  %v474_v20 = vld [vmem:[%s3198_s1 + $0x18] sm:$0xff]  ;;  %v689_v21 = vld [vmem:[%s3203_s6 + $0xc0] sm:$0xff]  ;;  %s1566_s23 = ssub.s32 (%p2226_p4), 29, %s2459_s22  ;;  %s1873_s24 = sshll.u32 (%p2226_p4), %s2214_s30, 8 }
  0x17   : > { %532 = vmatprep.subr.mxu0 %v480_v7  ;;  %1906 = vmatpush1.msra.mxu1 %v693_v13  ;;  %v473_v22 = vld [vmem:[%s3198_s1 + $0x10] sm:$0xff]  ;;  %v688_v23 = vld [vmem:[%s3203_s6 + $0xb8] sm:$0xff]  ;;  %v472_v24 = vld [vmem:[%s3198_s1 + $0x8] sm:$0xff]  ;;  %p1567_p8 = scmp.lt.s32.totalorder (%p2226_p4), %s1566_s23, 16  ;;  %s3061_s11 = scalar_lea.vmem (%p2226_p4), %s3205_s8, %s1873_s24  }
  0x18   : > { %533 = vmatpush1.msra.mxu0 %v479_v8  ;;  %1878 = vmatprep.subr.mxu1 %v692_v15  ;;  %v687_v25 = vld [vmem:[%s3203_s6 + $0xb0] sm:$0xff]  ;;  %v471_v26 = vld [vmem:[%s3198_s1] sm:$0xff]  ;;  %v686_v27 = vld [vmem:[%s3203_s6 + $0xa8] sm:$0xff] }
  0x19   : > { %534 = vmatprep.subr.mxu0 %v478_v9  ;;  %1907 = vmatpush1.msra.mxu1 %v691_v17  ;;  %v470_v28 = vld [vmem:[%s3197_s0] sm:$0x1]  ;;  %v684_v30 = vld [vmem:[%s3203_s6 + $0x98] sm:$0xff]  ;;  %v683_v31 = vld [vmem:[%s3203_s6 + $0x90] sm:$0xff] }
  0x1a   : > { %535 = vmatpush1.msra.mxu0 %v477_v14  ;;  %1879 = vmatprep.subr.mxu1 %v690_v19  ;;  %v685_v29 = vld [vmem:[%s3203_s6 + $0xa0] sm:$0xff]  ;;  %v682_v32 = vld [vmem:[%s3203_s6 + $0x88] sm:$0xff]  ;;  %v680_v34 = vld [vmem:[%s3203_s6 + $0x78] sm:$0xff] }
  0x1b   : > { %536 = vmatprep.subr.mxu0 %v476_v16  ;;  %1908 = vmatpush1.msra.mxu1 %v689_v21  ;;  %v681_v33 = vld [vmem:[%s3203_s6 + $0x80] sm:$0xff]  ;;  %v679_v35 = vld [vmem:[%s3203_s6 + $0x70] sm:$0xff]  ;;  %v678_v36 = vld [vmem:[%s3203_s6 + $0x68] sm:$0xff] }
  0x1c   : > { %537 = vmatpush1.msra.mxu0 %v475_v18  ;;  %1880 = vmatprep.subr.mxu1 %v688_v23  ;;  %v677_v37 = vld [vmem:[%s3203_s6 + $0x60] sm:$0xff]  ;;  %v676_v38 = vld [vmem:[%s3203_s6 + $0x58] sm:$0xff]  ;;  %v675_v39 = vld [vmem:[%s3203_s6 + $0x50] sm:$0xff] }
  0x1d   : > { %538 = vmatprep.subr.mxu0 %v474_v20  ;;  %1909 = vmatpush1.msra.mxu1 %v687_v25  ;;  %v674_v40 = vld [vmem:[%s3203_s6 + $0x48] sm:$0xff]  ;;  %v673_v41 = vld [vmem:[%s3203_s6 + $0x40] sm:$0xff]  ;;  %v672_v42 = vld [vmem:[%s3203_s6 + $0x38] sm:$0xff] }
  0x1e   : > { %539 = vmatpush1.msra.mxu0 %v473_v22  ;;  %1881 = vmatprep.subr.mxu1 %v686_v27  ;;  %v671_v43 = vld [vmem:[%s3203_s6 + $0x30] sm:$0xff]  ;;  %v670_v44 = vld [vmem:[%s3203_s6 + $0x28] sm:$0xff]  ;;  %v669_v45 = vld [vmem:[%s3203_s6 + $0x20] sm:$0xff] }
  0x1f   : > { %540 = vmatprep.subr.mxu0 %v472_v24  ;;  %1910 = vmatpush1.msra.mxu1 %v685_v29  ;;  %v668_v46 = vld [vmem:[%s3203_s6 + $0x18] sm:$0xff]  ;;  %v667_v47 = vld [vmem:[%s3203_s6 + $0x10] sm:$0xff]  ;;  %v666_v48 = vld [vmem:[%s3203_s6 + $0x8] sm:$0xff] }
  0x20   : > { %541 = vmatpush1.msra.mxu0 %v471_v26  ;;  %1882 = vmatprep.subr.mxu1 %v684_v30  ;;  %v665_v49 = vld [vmem:[%s3203_s6] sm:$0xff]  ;;  %v722_v50 = vld [vmem:[%s3203_s6 + $0x1c8] sm:$0xff]  ;;  %v720_v52 = vld [vmem:[%s3203_s6 + $0x1b8] sm:$0xff] }
  0x21   : > { %1831 = vmatmul.mubr.msk.f32.vlgmr.msra.gmra.mxu0 %vm499_vm1, %v470_v28  ;;  %772 = vmatprep.subr.mxu0 %v696_v10  ;;  %v721_v51 = vld [vmem:[%s3203_s6 + $0x1c0] sm:$0xff]  ;;  %v719_v53 = vld [vmem:[%s3203_s6 + $0x1b0] sm:$0xff]  ;;  %v718_v54 = vld [vmem:[%s3203_s6 + $0x1a8] sm:$0xff] }
  0x22   : > { %773 = vmatpush1.msra.mxu0 %v695_v11  ;;  %1911 = vmatpush1.msra.mxu1 %v683_v31  ;;  %v717_v55 = vld [vmem:[%s3203_s6 + $0x1a0] sm:$0xff]  ;;  %v716_v56 = vld [vmem:[%s3203_s6 + $0x198] sm:$0xff]  ;;  %v715_v57 = vld [vmem:[%s3203_s6 + $0x190] sm:$0xff] }
  0x23   : > { %774 = vmatprep.subr.mxu0 %v694_v12  ;;  %1883 = vmatprep.subr.mxu1 %v682_v32  ;;  %v714_v58 = vld [vmem:[%s3203_s6 + $0x188] sm:$0xff]  ;;  %v713_v59 = vld [vmem:[%s3203_s6 + $0x180] sm:$0xff]  ;;  %v712_v60 = vld [vmem:[%s3203_s6 + $0x178] sm:$0xff]  ;;  %v489_v12 = vlaneseq }
  0x24   : > { %775 = vmatpush1.msra.mxu0 %v693_v13  ;;  %1912 = vmatpush1.msra.mxu1 %v681_v33  ;;  %v711_v61 = vld [vmem:[%s3203_s6 + $0x170] sm:$0xff]  ;;  %v710_v62 = vld [vmem:[%s3203_s6 + $0x168] sm:$0xff]  ;;  %v709_v63 = vld [vmem:[%s3203_s6 + $0x160] sm:$0xff] }
  0x25   : > { %776 = vmatprep.subr.mxu0 %v692_v15  ;;  %1884 = vmatprep.subr.mxu1 %v680_v34  ;;  %v708_v0 = vld [vmem:[%s3203_s6 + $0x158] sm:$0xff]  ;;  %v707_v1 = vld [vmem:[%s3203_s6 + $0x150] sm:$0xff]  ;;  %v706_v2 = vld [vmem:[%s3203_s6 + $0x148] sm:$0xff]  ;;  %v490_v13 = vshrl.u32 %v489_v12, 7 }
  0x26   : > { %777 = vmatpush1.msra.mxu0 %v691_v17  ;;  %1913 = vmatpush1.msra.mxu1 %v679_v35  ;;  %v705_v3 = vld [vmem:[%s3203_s6 + $0x140] sm:$0xff]  ;;  %v704_v4 = vld [vmem:[%s3203_s6 + $0x138] sm:$0xff]  ;;  %v703_v5 = vld [vmem:[%s3203_s6 + $0x130] sm:$0xff] }
  0x27   : > { %778 = vmatprep.subr.mxu0 %v690_v19  ;;  %1885 = vmatprep.subr.mxu1 %v678_v36  ;;  %v702_v6 = vld [vmem:[%s3203_s6 + $0x128] sm:$0xff]  ;;  %v701_v7 = vld [vmem:[%s3203_s6 + $0x120] sm:$0xff]  ;;  %v700_v8 = vld [vmem:[%s3203_s6 + $0x118] sm:$0xff]  ;;  %v491_v14 = vsub.s32 0, %v490_v13  ;;  %v495_v16 = vsub.s32 1, %v490_v13 }
  0x28   : > { %779 = vmatpush1.msra.mxu0 %v689_v21  ;;  %1914 = vmatpush1.msra.mxu1 %v677_v37  ;;  %v699_v9 = vld [vmem:[%s3203_s6 + $0x110] sm:$0xff]  ;;  %v698_v10 = vld [vmem:[%s3203_s6 + $0x108] sm:$0xff]  ;;  %v697_v11 = vld [vmem:[%s3203_s6 + $0x100] sm:$0xff] }
  0x29   : > { %780 = vmatprep.subr.mxu0 %v688_v23  ;;  %1886 = vmatprep.subr.mxu1 %v676_v38  ;;  %v487_v15 = vld [vmem:[%s3199_s2] sm:$0x3]  ;;  %v603_v13 = vld [vmem:[%s2471_s29 + $0x50] sm:$0xff] }
  0x2a   : > { %781 = vmatpush1.msra.mxu0 %v687_v25  ;;  %1915 = vmatpush1.msra.mxu1 %v675_v39  ;;  %v492_v17 = vrot.slane %v487_v15, %v491_v14  ;;  %v496_v18 = vrot.slane %v487_v15, %v495_v16  ;;  %v618_v15 = vld [vmem:[%s2471_s29 + $0xc8] sm:$0xff] }
  0x2b   : > { %782 = vmatprep.subr.mxu0 %v686_v27  ;;  %1887 = vmatprep.subr.mxu1 %v674_v40 }
  0x2c   : > { %783 = vmatpush1.msra.mxu0 %v685_v29  ;;  %1916 = vmatpush1.msra.mxu1 %v673_v41 }
  0x2d   : > { %784 = vmatprep.subr.mxu0 %v684_v30  ;;  %1888 = vmatprep.subr.mxu1 %v672_v42 }
  0x2e   : > { %785 = vmatpush1.msra.mxu0 %v683_v31  ;;  %1917 = vmatpush1.msra.mxu1 %v671_v43 }
  0x2f   : > { %786 = vmatprep.subr.mxu0 %v682_v32  ;;  %1889 = vmatprep.subr.mxu1 %v670_v44  ;;  %v594_v32 = vld [vmem:[%s2471_s29 + $0x8] sm:$0xff] }
  0x30   : > { %787 = vmatpush1.msra.mxu0 %v681_v33  ;;  %1918 = vmatpush1.msra.mxu1 %v669_v45  ;;  %v606_v33 = vld [vmem:[%s2471_s29 + $0x68] sm:$0xff] }
  0x31   : > { %788 = vmatprep.subr.mxu0 %v680_v34  ;;  %1890 = vmatprep.subr.mxu1 %v668_v46 }
  0x32   : > { %789 = vmatpush1.msra.mxu0 %v679_v35  ;;  %1919 = vmatpush1.msra.mxu1 %v667_v47  ;;  %v593_v35 = vld [vmem:[%s2471_s29] sm:$0xff] }
  0x33   : > { %790 = vmatprep.subr.mxu0 %v678_v36  ;;  %1891 = vmatprep.subr.mxu1 %v666_v48  ;;  %v605_v36 = vld [vmem:[%s2471_s29 + $0x60] sm:$0xff] }
  0x34   : > { %791 = vmatpush1.msra.mxu0 %v677_v37  ;;  %1920 = vmatpush1.msra.mxu1 %v665_v49  ;;  %v596_v37 = vld [vmem:[%s2471_s29 + $0x18] sm:$0xff] }
  0x35   : > { %792 = vmatprep.subr.mxu0 %v676_v38  ;;  %1892 = vmatprep.subr.mxu1 %v722_v50  ;;  %v608_v38 = vld [vmem:[%s2471_s29 + $0x78] sm:$0xff] }
  0x36   : > { %793 = vmatpush1.msra.mxu0 %v675_v39  ;;  %1921 = vmatpush2.msra.mxu1 %v721_v51 }
  0x37   : > { %794 = vmatprep.subr.mxu0 %v674_v40  ;;  %1893 = vmatprep.subr.mxu1 %v720_v52 }
  0x38   : > { %795 = vmatpush1.msra.mxu0 %v673_v41  ;;  %1922 = vmatpush2.msra.mxu1 %v719_v53 }
  0x39   : > { %796 = vmatprep.subr.mxu0 %v672_v42  ;;  %1894 = vmatprep.subr.mxu1 %v718_v54 }
  0x3a   : > { %797 = vmatpush1.msra.mxu0 %v671_v43  ;;  %1923 = vmatpush2.msra.mxu1 %v717_v55 }
  0x3b   : > { %798 = vmatprep.subr.mxu0 %v670_v44  ;;  %1895 = vmatprep.subr.mxu1 %v716_v56 }
  0x3c   : > { %799 = vmatpush1.msra.mxu0 %v669_v45  ;;  %1924 = vmatpush2.msra.mxu1 %v715_v57  ;;  %v595_v45 = vld [vmem:[%s2471_s29 + $0x10] sm:$0xff] }
  0x3d   : > { %800 = vmatprep.subr.mxu0 %v668_v46  ;;  %1896 = vmatprep.subr.mxu1 %v714_v58  ;;  %v607_v46 = vld [vmem:[%s2471_s29 + $0x70] sm:$0xff] }
  0x3e   : > { %801 = vmatpush1.msra.mxu0 %v667_v47  ;;  %1925 = vmatpush2.msra.mxu1 %v713_v59  ;;  %v598_v47 = vld [vmem:[%s2471_s29 + $0x28] sm:$0xff] }
  0x3f   : > { %802 = vmatprep.subr.mxu0 %v666_v48  ;;  %1897 = vmatprep.subr.mxu1 %v712_v60  ;;  %v610_v48 = vld [vmem:[%s2471_s29 + $0x88] sm:$0xff] }
  0x40   : > { %803 = vmatpush1.msra.mxu0 %v665_v49  ;;  %1926 = vmatpush2.msra.mxu1 %v711_v61 }
  0x41   : > { %810 = vmatprep.subr.mxu0 %v722_v50  ;;  %1898 = vmatprep.subr.mxu1 %v710_v62 }
  0x42   : > { %811 = vmatpush2.msra.mxu0 %v721_v51  ;;  %1927 = vmatpush2.msra.mxu1 %v709_v63 }
  0x43   : > { %812 = vmatprep.subr.mxu0 %v720_v52  ;;  %1899 = vmatprep.subr.mxu1 %v708_v0 }
  0x44   : > { %813 = vmatpush2.msra.mxu0 %v719_v53  ;;  %1928 = vmatpush2.msra.mxu1 %v707_v1  ;;  %v597_v53 = vld [vmem:[%s2471_s29 + $0x20] sm:$0xff] }
  0x45   : > { %814 = vmatprep.subr.mxu0 %v718_v54  ;;  %1900 = vmatprep.subr.mxu1 %v706_v2  ;;  %v609_v54 = vld [vmem:[%s2471_s29 + $0x80] sm:$0xff] }
  0x46   : > { %815 = vmatpush2.msra.mxu0 %v717_v55  ;;  %1929 = vmatpush2.msra.mxu1 %v705_v3  ;;  %v600_v55 = vld [vmem:[%s2471_s29 + $0x38] sm:$0xff] }
  0x47   : > { %816 = vmatprep.subr.mxu0 %v716_v56  ;;  %1901 = vmatprep.subr.mxu1 %v704_v4  ;;  %v612_v56 = vld [vmem:[%s2471_s29 + $0x98] sm:$0xff] }
  0x48   : > { %817 = vmatpush2.msra.mxu0 %v715_v57  ;;  %1930 = vmatpush2.msra.mxu1 %v703_v5 }
  0x49   : > { %818 = vmatprep.subr.mxu0 %v714_v58  ;;  %1902 = vmatprep.subr.mxu1 %v702_v6 }
  0x4a   : > { %819 = vmatpush2.msra.mxu0 %v713_v59  ;;  %1931 = vmatpush2.msra.mxu1 %v701_v7 }
  0x4b   : > { %820 = vmatprep.subr.mxu0 %v712_v60  ;;  %1903 = vmatprep.subr.mxu1 %v700_v8 }
  0x4c   : > { %821 = vmatpush2.msra.mxu0 %v711_v61  ;;  %1932 = vmatpush2.msra.mxu1 %v699_v9  ;;  %v599_v61 = vld [vmem:[%s2471_s29 + $0x30] sm:$0xff] }
  0x4d   : > { %822 = vmatprep.subr.mxu0 %v710_v62  ;;  %1904 = vmatprep.subr.mxu1 %v698_v10  ;;  %v611_v62 = vld [vmem:[%s2471_s29 + $0x90] sm:$0xff] }
  0x4e   : > { %823 = vmatpush2.msra.mxu0 %v709_v63  ;;  %1933 = vmatpush2.msra.mxu1 %v697_v11  ;;  %v602_v63 = vld [vmem:[%s2471_s29 + $0x48] sm:$0xff] }
  0x4f   : > { %824 = vmatprep.subr.mxu0 %v708_v0  ;;  %v614_v0 = vld [vmem:[%s2471_s29 + $0xa8] sm:$0xff] }
  0x50   : > { %825 = vmatpush2.msra.mxu0 %v707_v1 }
  0x51   : > { %826 = vmatprep.subr.mxu0 %v706_v2 }
  0x52   : > { %827 = vmatpush2.msra.mxu0 %v705_v3 }
  0x53   : > { %828 = vmatprep.subr.mxu0 %v704_v4 }
  0x54   : > { %829 = vmatpush2.msra.mxu0 %v703_v5  ;;  %v601_v5 = vld [vmem:[%s2471_s29 + $0x40] sm:$0xff] }
  0x55   : > { %830 = vmatprep.subr.mxu0 %v702_v6  ;;  %v613_v6 = vld [vmem:[%s2471_s29 + $0xa0] sm:$0xff] }
  0x56   : > { %831 = vmatpush2.msra.mxu0 %v701_v7  ;;  %v604_v7 = vld [vmem:[%s2471_s29 + $0x58] sm:$0xff] }
  0x57   : > { %832 = vmatprep.subr.mxu0 %v700_v8  ;;  %v616_v8 = vld [vmem:[%s2471_s29 + $0xb8] sm:$0xff] }
  0x58   : > { %833 = vmatpush2.msra.mxu0 %v699_v9 }
  0x59   : > { %834 = vmatprep.subr.mxu0 %v698_v10 }
  0x5a   : > { %835 = vmatpush2.msra.mxu0 %v697_v11 }
  0xe1   : > { %v576_v19 = vpop.f32.mrf.mxu0 }
  0xe2   : > { %v577_v20 = vadd.f32 %v576_v19, %v492_v17  ;;  %v617_v19 = vld [vmem:[%s2471_s29 + $0xc0] sm:$0xff] }
  0xe3   : > { %v578_v21 = vpop.f32.mrf.mxu0 }
  0xe4   : > { %v1832_v22 = vmul.f32 -1.442695, %v577_v20  ;;  %v579_v23 = vadd.f32 %v578_v21, %v496_v18  ;;  %v620_v20 = vld [vmem:[%s2471_s29 + $0xd8] sm:$0xff] }
  0xe6   : > { %2026 = vpow2.f32 %v1832_v22  ;;  %v1833_v24 = vmul.f32 -1.442695, %v579_v23  ;;  %v619_v23 = vld [vmem:[%s2471_s29 + $0xd0] sm:$0xff] }
  0xe8   : > { %2028 = vpow2.f32 %v1833_v24  ;;  %v622_v24 = vld [vmem:[%s2471_s29 + $0xe8] sm:$0xff] }
  0xf3   : > { %v2027_v25 = vpop.eup %2026 }
  0xf4   : > { %v587_v26 = vadd.f32 1.0, %v2027_v25 }
  0xf5   : > { %v2029_v27 = vpop.eup %2028 }
  0xf6   : > { %2030 = vrcp.f32 %v587_v26  ;;  %v588_v28 = vadd.f32 1.0, %v2029_v27  ;;  %v621_v27 = vld [vmem:[%s2471_s29 + $0xe0] sm:$0xff] }
  0xf8   : > { %2032 = vrcp.f32 %v588_v28  ;;  %v624_v28 = vld [vmem:[%s2471_s29 + $0xf8] sm:$0xff] }
 0x103   : > { %v2031_v29 = vpop.eup %2030 }
 0x104   : > { %v2473_v31 = vrot.slane %v2031_v29, %v491_v14 }
 0x105   : > { %v2033_v30 = vpop.eup %2032 }
 0x106   : > { %v2477_v34 = vrot.slane %v2033_v30, %v491_v14  ;;  %v633_v41 = vmul.f32 %v2473_v31, %v593_v35  ;;  %v645_v42 = vmul.f32 %v2473_v31, %v605_v36  ;;  %v635_v49 = vmul.f32 %v2473_v31, %v595_v45  ;;  %v615_v14 = vld [vmem:[%s2471_s29 + $0xb0] sm:$0xff] }
 0x107   : > { %v647_v50 = vmul.f32 %v2473_v31, %v607_v46  ;;  %v637_v57 = vmul.f32 %v2473_v31, %v597_v53  ;;  %v649_v58 = vmul.f32 %v2473_v31, %v609_v54  ;;  %v639_v1 = vmul.f32 %v2473_v31, %v599_v61 }
 0x108   : > { %v634_v39 = vmul.f32 %v2477_v34, %v594_v32  ;;  %v646_v40 = vmul.f32 %v2477_v34, %v606_v33  ;;  %v636_v43 = vmul.f32 %v2477_v34, %v596_v37  ;;  %v648_v44 = vmul.f32 %v2477_v34, %v608_v38  ;;  %v623_v32 = vld [vmem:[%s2471_s29 + $0xf0] sm:$0xff] }
 0x109   : > { %v638_v51 = vmul.f32 %v2477_v34, %v598_v47  ;;  %v650_v52 = vmul.f32 %v2477_v34, %v610_v48  ;;  %v640_v59 = vmul.f32 %v2477_v34, %v600_v55  ;;  %v652_v60 = vmul.f32 %v2477_v34, %v612_v56 }
 0x10a   : > { %1834 = vmatprep.mubr.msk.f32.mxu0 %vm723_vm2, %v634_v39  ;;  %1840 = vmatprep.mubr.msk.f32.mxu1 %vm723_vm2, %v646_v40  ;;  %v651_v2 = vmul.f32 %v2473_v31, %v611_v62  ;;  %v642_v3 = vmul.f32 %v2477_v34, %v602_v63  ;;  %v654_v4 = vmul.f32 %v2477_v34, %v614_v0 }
 0x10b   : > { %837 = vmatmul.mubr.f32.vlgmr.msra.gmra.mxu0 %v633_v41  ;;  %873 = vmatmul.mubr.f32.vlgmr.msra.gmra.mxu1 %v645_v42  ;;  %v641_v9 = vmul.f32 %v2473_v31, %v601_v5  ;;  %v653_v10 = vmul.f32 %v2473_v31, %v613_v6  ;;  %v644_v11 = vmul.f32 %v2477_v34, %v604_v7 }
 0x10c   : > { %1835 = vmatprep.mubr.msk.f32.mxu0 %vm723_vm2, %v636_v43  ;;  %1841 = vmatprep.mubr.msk.f32.mxu1 %vm723_vm2, %v648_v44  ;;  %v656_v12 = vmul.f32 %v2477_v34, %v616_v8  ;;  %v643_v16 = vmul.f32 %v2473_v31, %v603_v13  ;;  %v655_v17 = vmul.f32 %v2473_v31, %v615_v14 }
 0x10d   : > { %v658_v18 = vmul.f32 %v2477_v34, %v618_v15  ;;  %v657_v21 = vmul.f32 %v2473_v31, %v617_v19  ;;  %v660_v22 = vmul.f32 %v2477_v34, %v620_v20  ;;  %v659_v25 = vmul.f32 %v2473_v31, %v619_v23 }
 0x10e   : > { %v662_v26 = vmul.f32 %v2477_v34, %v622_v24  ;;  %v661_v29 = vmul.f32 %v2473_v31, %v621_v27  ;;  %v664_v30 = vmul.f32 %v2477_v34, %v624_v28  ;;  %v663_v33 = vmul.f32 %v2473_v31, %v623_v32 }
 0x10f   : > { %843 = vmatmul.mubr.f32.gmra.mxu0 %v635_v49  ;;  %879 = vmatmul.mubr.f32.gmra.mxu1 %v647_v50 }
 0x110   : > { %1836 = vmatprep.mubr.msk.f32.mxu0 %vm723_vm2, %v638_v51  ;;  %1842 = vmatprep.mubr.msk.f32.mxu1 %vm723_vm2, %v650_v52 }
 0x113   : > { %849 = vmatmul.mubr.f32.gmra.mxu0 %v637_v57  ;;  %885 = vmatmul.mubr.f32.gmra.mxu1 %v649_v58 }
 0x114   : > { %1837 = vmatprep.mubr.msk.f32.mxu0 %vm723_vm2, %v640_v59  ;;  %1843 = vmatprep.mubr.msk.f32.mxu1 %vm723_vm2, %v652_v60 }
 0x117   : > { %855 = vmatmul.mubr.f32.gmra.mxu0 %v639_v1  ;;  %891 = vmatmul.mubr.f32.gmra.mxu1 %v651_v2 }
 0x118   : > { %1838 = vmatprep.mubr.msk.f32.mxu0 %vm723_vm2, %v642_v3  ;;  %1844 = vmatprep.mubr.msk.f32.mxu1 %vm723_vm2, %v654_v4 }
 0x11b   : > { %861 = vmatmul.mubr.f32.gmra.mxu0 %v641_v9  ;;  %897 = vmatmul.mubr.f32.gmra.mxu1 %v653_v10 }
 0x11c   : > { %1839 = vmatprep.mubr.msk.f32.mxu0 %vm723_vm2, %v644_v11  ;;  %1845 = vmatprep.mubr.msk.f32.mxu1 %vm723_vm2, %v656_v12 }
 0x11f   : > { %867 = vmatmul.mubr.f32.gmra.mxu0 %v643_v16  ;;  %903 = vmatmul.mubr.f32.gmra.mxu1 %v655_v17 }
 0x120   : > { %1846 = vmatprep.mubr.msk.f32.mxu1 %vm723_vm2, %v658_v18 }
 0x123   : > { %909 = vmatmul.mubr.f32.gmra.mxu1 %v657_v21 }
 0x124   : > { %1847 = vmatprep.mubr.msk.f32.mxu1 %vm723_vm2, %v660_v22 }
 0x127   : > { %915 = vmatmul.mubr.f32.gmra.mxu1 %v659_v25 }
 0x128   : > { %1848 = vmatprep.mubr.msk.f32.mxu1 %vm723_vm2, %v662_v26 }
 0x12b   : > { %921 = vmatmul.mubr.f32.gmra.mxu1 %v661_v29 }
 0x12c   : > { %1849 = vmatprep.mubr.msk.f32.mxu1 %vm723_vm2, %v664_v30 }
 0x12f   : > { %927 = vmatmul.mubr.f32.gmra.mxu1 %v663_v33 }
 0x1cb   : > { %v2557_v35 = vpop.f32.mrf.mxu0  ;;  %v2559_v36 = vpop.f32.mrf.mxu1 }
 0x1cd   : > { %v2561_v37 = vpop.f32.mrf.mxu0  ;;  %v2563_v38 = vpop.f32.mrf.mxu1 }
 0x1ce   : > { %v934_v39 = vsel %vm933_vm3, %v2561_v37, 0.0  ;;  %v958_v31 = vsel %vm933_vm3, %v2563_v38, 0.0 }
 0x1cf   : > { %v2567_v34 = vpop.f32.mrf.mxu0  ;;  %v2569_v40 = vpop.f32.mrf.mxu1  ;;  %v935_v41 = vadd.f32 %v934_v39, %v2557_v35  ;;  %v959_v48 = vadd.f32 %v958_v31, %v2559_v36  ;;  %v2155_v39 = vmov 0  }
 0x1d0   : > { %2024 = vset.pattern.permute.xlu1 %v2155_v39  ;;  %2025 = vset.pattern.permute.xlu0 %v2155_v39 }
 0x1d1   : > { %v2574_v42 = vpop.f32.mrf.mxu1  ;;  %936 = vadd.xlane.f32.xlu0 %v935_v41  ;;  %v2576_v43 = vpop.f32.mrf.mxu0 }
 0x1d2   : > { %v962_v44 = vsel %vm933_vm3, %v2574_v42, 0.0  ;;  %v938_v49 = vsel %vm933_vm3, %v2576_v43, 0.0 }
 0x1d3   : > { %v2580_v45 = vpop.f32.mrf.mxu0  ;;  %v2582_v46 = vpop.f32.mrf.mxu1  ;;  %v963_v47 = vadd.f32 %v962_v44, %v2569_v40  ;;  %v939_v55 = vadd.f32 %v938_v49, %v2567_v34 }
 0x1d5   : > { %964 = vadd.xlane.f32.xlu1 %v963_v47  ;;  %v2588_v50 = vpop.f32.mrf.mxu1  ;;  %960 = vadd.xlane.f32.xlu0 %v959_v48  ;;  %v2590_v51 = vpop.f32.mrf.mxu0 }
 0x1d6   : > { %v942_v52 = vsel %vm933_vm3, %v2590_v51, 0.0  ;;  %v966_v57 = vsel %vm933_vm3, %v2588_v50, 0.0 }
 0x1d7   : > { %v2594_v53 = vpop.f32.mrf.mxu0  ;;  %v2596_v54 = vpop.f32.mrf.mxu1  ;;  %v943_v56 = vadd.f32 %v942_v52, %v2580_v45  ;;  %v967_v63 = vadd.f32 %v966_v57, %v2582_v46 }
 0x1d9   : > { %v2602_v58 = vpop.f32.mrf.mxu1  ;;  %940 = vadd.xlane.f32.xlu0 %v939_v55  ;;  %944 = vadd.xlane.f32.xlu1 %v943_v56  ;;  %v2604_v59 = vpop.f32.mrf.mxu0 }
 0x1da   : > { %v946_v60 = vsel %vm933_vm3, %v2604_v59, 0.0  ;;  %v970_v1 = vsel %vm933_vm3, %v2602_v58, 0.0 }
 0x1db   : > { %v2608_v61 = vpop.f32.mrf.mxu0  ;;  %v2610_v62 = vpop.f32.mrf.mxu1  ;;  %v947_v0 = vadd.f32 %v946_v60, %v2594_v53  ;;  %v971_v7 = vadd.f32 %v970_v1, %v2596_v54 }
 0x1dd   : > { %v2616_v2 = vpop.f32.mrf.mxu1  ;;  %968 = vadd.xlane.f32.xlu0 %v967_v63  ;;  %948 = vadd.xlane.f32.xlu1 %v947_v0  ;;  %v2618_v3 = vpop.f32.mrf.mxu0 }
 0x1de   : > { %v950_v4 = vsel %vm933_vm3, %v2618_v3, 0.0  ;;  %v974_v9 = vsel %vm933_vm3, %v2616_v2, 0.0 }
 0x1df   : > { %v2622_v5 = vpop.f32.mrf.mxu0  ;;  %v2624_v6 = vpop.f32.mrf.mxu1  ;;  %v951_v8 = vadd.f32 %v950_v4, %v2608_v61  ;;  %v975_v14 = vadd.f32 %v974_v9, %v2610_v62 }
 0x1e1   : > { %v2630_v10 = vpop.f32.mrf.mxu1  ;;  %972 = vadd.xlane.f32.xlu1 %v971_v7  ;;  %952 = vadd.xlane.f32.xlu0 %v951_v8  ;;  %v2632_v11 = vpop.f32.mrf.mxu0 }
 0x1e2   : > { %v954_v12 = vsel %vm933_vm3, %v2632_v11, 0.0  ;;  %v978_v16 = vsel %vm933_vm3, %v2630_v10, 0.0 }
 0x1e3   : > { %v2636_v13 = vpop.f32.mrf.mxu1  ;;  %v955_v15 = vadd.f32 %v954_v12, %v2622_v5  ;;  %v979_v21 = vadd.f32 %v978_v16, %v2624_v6 }
 0x1e5   : > { %v2642_v17 = vpop.f32.mrf.mxu1  ;;  %976 = vadd.xlane.f32.xlu0 %v975_v14  ;;  %956 = vadd.xlane.f32.xlu1 %v955_v15 }
 0x1e6   : > { %v982_v18 = vsel %vm933_vm3, %v2642_v17, 0.0 }
 0x1e7   : > { %v2646_v19 = vpop.f32.mrf.mxu1  ;;  %v983_v20 = vadd.f32 %v982_v18, %v2636_v13 }
 0x1e9   : > { %v2650_v22 = vpop.f32.mrf.mxu1  ;;  %984 = vadd.xlane.f32.xlu0 %v983_v20  ;;  %980 = vadd.xlane.f32.xlu1 %v979_v21 }
 0x1ea   : > { %v986_v23 = vsel %vm933_vm3, %v2650_v22, 0.0 }
 0x1eb   : > { %v2654_v24 = vpop.f32.mrf.mxu1  ;;  %v987_v25 = vadd.f32 %v986_v23, %v2646_v19 }
 0x1ed   : > { %v2657_v26 = vpop.f32.mrf.mxu1  ;;  %988 = vadd.xlane.f32.xlu1 %v987_v25 }
 0x1ee   : > { %v990_v27 = vsel %vm933_vm3, %v2657_v26, 0.0 }
 0x1ef   : > { %v2661_v28 = vpop.f32.mrf.mxu1  ;;  %v991_v29 = vadd.f32 %v990_v27, %v2654_v24 }
 0x1f1   : > { %v2664_v30 = vpop.f32.mrf.mxu1  ;;  %992 = vadd.xlane.f32.xlu0 %v991_v29 }
 0x1f2   : > { %v994_v32 = vsel %vm933_vm3, %v2664_v30, 0.0 }
 0x1f3   : > { %v995_v33 = vadd.f32 %v994_v32, %v2661_v28 }
 0x1f5   : > { %996 = vadd.xlane.f32.xlu1 %v995_v33 }
 0x25a   : > { %v937_v41 = vpop.xlane.xlu0 %936 }
 0x25b   : > { %v998_v31 = vmul.f32 0.0051020407, %v937_v41 }
 0x25d   : > { %v2670_v44 = vsub.f32 %v2557_v35, %v998_v31  ;;  %v2673_v47 = vsub.f32 %v2561_v37, %v998_v31 }
 0x25e   : > { %v965_v48 = vpop.xlane.xlu1 %964  ;;  %v961_v49 = vpop.xlane.xlu0 %960 }
 0x25f   : > { %v1004_v52 = vmul.f32 0.0051020407, %v961_v49  ;;  %v1046_v55 = vmul.f32 %v2670_v44, %v2670_v44  ;;  %v1047_v56 = vmul.f32 %v2673_v47, %v2673_v47  ;;  %v1005_v57 = vmul.f32 0.0051020407, %v965_v48 }
 0x261   : > { %v2680_v60 = vsub.f32 %v2559_v36, %v1004_v52  ;;  %v2683_v63 = vsub.f32 %v2563_v38, %v1004_v52  ;;  %v1078_v37 = vsel %vm933_vm3, %v1047_v56, 0.0  ;;  %v2689_v9 = vsub.f32 %v2574_v42, %v1005_v57 }
 0x262   : > { %v941_v35 = vpop.xlane.xlu0 %940  ;;  %v945_v0 = vpop.xlane.xlu1 %944  ;;  %v1079_v7 = vadd.f32 %v1078_v37, %v1046_v55 }
 0x263   : > { %v999_v1 = vmul.f32 0.0051020407, %v941_v35  ;;  %v1000_v4 = vmul.f32 0.0051020407, %v945_v0  ;;  %v1058_v8 = vmul.f32 %v2680_v60, %v2680_v60  ;;  %v1059_v36 = vmul.f32 %v2683_v63, %v2683_v63 }
 0x264   : > { %1080 = vadd.xlane.f32.xlu0 %v1079_v7 }
 0x265   : > { %v2694_v12 = vsub.f32 %v2567_v34, %v999_v1  ;;  %v2697_v38 = vsub.f32 %v2576_v43, %v999_v1  ;;  %v2700_v14 = vsub.f32 %v2580_v45, %v1000_v4  ;;  %v2703_v15 = vsub.f32 %v2590_v51, %v1000_v4 }
 0x266   : > { %v969_v16 = vpop.xlane.xlu0 %968  ;;  %v949_v18 = vpop.xlane.xlu1 %948  ;;  %v1102_v42 = vsel %vm933_vm3, %v1059_v36, 0.0  ;;  %v2709_v43 = vsub.f32 %v2569_v40, %v1005_v57  ;;  %v1061_v40 = vmul.f32 %v2689_v9, %v2689_v9 }
 0x267   : > { %v1006_v20 = vmul.f32 0.0051020407, %v969_v16  ;;  %v1001_v21 = vmul.f32 0.0051020407, %v949_v18  ;;  %v1103_v23 = vadd.f32 %v1102_v42, %v1058_v8  ;;  %v1050_v34 = vmul.f32 %v2700_v14, %v2700_v14 }
 0x268   : > { %v1051_v45 = vmul.f32 %v2703_v15, %v2703_v15  ;;  %v1048_v51 = vmul.f32 %v2694_v12, %v2694_v12  ;;  %v1049_v25 = vmul.f32 %v2697_v38, %v2697_v38  ;;  %v1106_v37 = vsel %vm933_vm3, %v1061_v40, 0.0 }
 0x269   : > { %v2718_v27 = vsub.f32 %v2582_v46, %v1006_v20  ;;  %v2721_v29 = vsub.f32 %v2588_v50, %v1006_v20  ;;  %v2724_v32 = vsub.f32 %v2604_v59, %v1001_v21  ;;  %1104 = vadd.xlane.f32.xlu0 %v1103_v23  ;;  %v2729_v33 = vsub.f32 %v2594_v53, %v1001_v21 }
 0x26a   : > { %v973_v39 = vpop.xlane.xlu1 %972  ;;  %v953_v41 = vpop.xlane.xlu0 %952  ;;  %v1086_v31 = vsel %vm933_vm3, %v1051_v45, 0.0  ;;  %v1082_v46 = vsel %vm933_vm3, %v1049_v25, 0.0  ;;  %v1060_v53 = vmul.f32 %v2709_v43, %v2709_v43 }
 0x26b   : > { %v1007_v48 = vmul.f32 0.0051020407, %v973_v39  ;;  %v1002_v49 = vmul.f32 0.0051020407, %v953_v41  ;;  %v1087_v50 = vadd.f32 %v1086_v31, %v1050_v34  ;;  %v1083_v52 = vadd.f32 %v1082_v46, %v1048_v51 }
 0x26c   : > { %v1062_v59 = vmul.f32 %v2718_v27, %v2718_v27  ;;  %v1063_v55 = vmul.f32 %v2721_v29, %v2721_v29  ;;  %v1053_v56 = vmul.f32 %v2724_v32, %v2724_v32  ;;  %v1052_v8 = vmul.f32 %v2729_v33, %v2729_v33 }
 0x26d   : > { %v2742_v57 = vsub.f32 %v2602_v58, %v1007_v48  ;;  %v2745_v35 = vsub.f32 %v2608_v61, %v1002_v49  ;;  %v2748_v0 = vsub.f32 %v2618_v3, %v1002_v49  ;;  %1088 = vadd.xlane.f32.xlu0 %v1087_v50  ;;  %1084 = vadd.xlane.f32.xlu1 %v1083_v52 }
 0x26e   : > { %v977_v1 = vpop.xlane.xlu0 %976  ;;  %v957_v4 = vpop.xlane.xlu1 %956  ;;  %v1110_v7 = vsel %vm933_vm3, %v1063_v55, 0.0  ;;  %v1090_v58 = vsel %vm933_vm3, %v1053_v56, 0.0  ;;  %v2758_v18 = vsub.f32 %v2596_v54, %v1007_v48  ;;  %v1107_v42 = vadd.f32 %v1106_v37, %v1060_v53 }
 0x26f   : > { %v1008_v36 = vmul.f32 0.0051020407, %v977_v1  ;;  %v1003_v16 = vmul.f32 0.0051020407, %v957_v4  ;;  %v1111_v61 = vadd.f32 %v1110_v7, %v1062_v59  ;;  %v1054_v3 = vmul.f32 %v2745_v35, %v2745_v35 }
 0x270   : > { %v1055_v20 = vmul.f32 %v2748_v0, %v2748_v0  ;;  %v1065_v21 = vmul.f32 %v2742_v57, %v2742_v57  ;;  %v1091_v40 = vadd.f32 %v1090_v58, %v1052_v8 }
 0x271   : > { %v2765_v23 = vsub.f32 %v2610_v62, %v1008_v36  ;;  %v2768_v34 = vsub.f32 %v2616_v2, %v1008_v36  ;;  %v2771_v45 = vsub.f32 %v2632_v11, %v1003_v16  ;;  %1112 = vadd.xlane.f32.xlu0 %v1111_v61  ;;  %1108 = vadd.xlane.f32.xlu1 %v1107_v42 }
 0x272   : > { %v985_v54 = vpop.xlane.xlu0 %984  ;;  %v981_v51 = vpop.xlane.xlu1 %980  ;;  %v1094_v25 = vsel %vm933_vm3, %v1055_v20, 0.0  ;;  %v2777_v46 = vsub.f32 %v2622_v5, %v1003_v16  ;;  %v1064_v11 = vmul.f32 %v2758_v18, %v2758_v18  ;;  %v1114_v48 = vsel %vm933_vm3, %v1065_v21, 0.0 }
 0x273   : > { %v1010_v39 = vmul.f32 0.0051020407, %v985_v54  ;;  %v1009_v41 = vmul.f32 0.0051020407, %v981_v51  ;;  %v1095_v31 = vadd.f32 %v1094_v25, %v1054_v3  ;;  %v1066_v62 = vmul.f32 %v2765_v23, %v2765_v23 }
 0x274   : > { %v1067_v2 = vmul.f32 %v2768_v34, %v2768_v34  ;;  %v1057_v5 = vmul.f32 %v2771_v45, %v2771_v45  ;;  %v1056_v1 = vmul.f32 %v2777_v46, %v2777_v46 }
 0x275   : > { %v2785_v49 = vsub.f32 %v2636_v13, %v1010_v39  ;;  %v2788_v50 = vsub.f32 %v2642_v17, %v1010_v39  ;;  %v2791_v52 = vsub.f32 %v2630_v10, %v1009_v41  ;;  %1096 = vadd.xlane.f32.xlu0 %v1095_v31  ;;  %1092 = vadd.xlane.f32.xlu1 %v1091_v40  ;;  %v1334_v31 = vld [vmem:[%s2840_s15] sm:$0xff] }
 0x276   : > { %v989_v59 = vpop.xlane.xlu1 %988  ;;  %v1118_v55 = vsel %vm933_vm3, %v1067_v2, 0.0  ;;  %v2801_v37 = vsub.f32 %v2624_v6, %v1009_v41  ;;  %v1115_v10 = vadd.f32 %v1114_v48, %v1064_v11  ;;  %v1098_v8 = vsel %vm933_vm3, %v1057_v5, 0.0  ;;  %v1336_v2 = vld [vmem:[%s2840_s15 + $0x10] sm:$0xff]  ;;  %v1337_v11 = vld [vmem:[%s2840_s15 + $0x18] sm:$0xff]  ;;  %v1338_v48 = vld [vmem:[%s2840_s15 + $0x20] sm:$0xff] }
 0x277   : > { %v1011_v53 = vmul.f32 0.0051020407, %v989_v59  ;;  %v1119_v56 = vadd.f32 %v1118_v55, %v1066_v62  ;;  %v1070_v13 = vmul.f32 %v2785_v49, %v2785_v49  ;;  %v1071_v17 = vmul.f32 %v2788_v50, %v2788_v50  ;;  %v1335_v62 = vld [vmem:[%s2840_s15 + $0x8] sm:$0xff]  ;;  %v1340_v59 = vld [vmem:[%s2840_s15 + $0x30] sm:$0xff]  ;;  %v1341_v55 = vld [vmem:[%s2840_s15 + $0x38] sm:$0xff] }
 0x278   : > { %v1069_v58 = vmul.f32 %v2791_v52, %v2791_v52  ;;  %v1099_v3 = vadd.f32 %v1098_v8, %v1056_v1  ;;  %v1339_v5 = vld [vmem:[%s2840_s15 + $0x28] sm:$0xff] }
 0x279   : > { %v2806_v4 = vsub.f32 %v2650_v22, %v1011_v53  ;;  %1120 = vadd.xlane.f32.xlu0 %v1119_v56  ;;  %v1126_v7 = vsel %vm933_vm3, %v1071_v17, 0.0  ;;  %1116 = vadd.xlane.f32.xlu1 %v1115_v10  ;;  %v2813_v61 = vsub.f32 %v2646_v19, %v1011_v53  ;;  %v1068_v22 = vmul.f32 %v2801_v37, %v2801_v37  ;;  %v1343_v53 = vld [vmem:[%s2840_s15 + $0x48] sm:$0xff]  ;;  %v1345_v56 = vld [vmem:[%s2840_s15 + $0x58] sm:$0xff] }
 0x27a   : > { %v993_v36 = vpop.xlane.xlu0 %992  ;;  %v1127_v16 = vadd.f32 %v1126_v7, %v1070_v13  ;;  %v1122_v21 = vsel %vm933_vm3, %v1069_v58, 0.0  ;;  %v1347_v13 = vld [vmem:[%s2840_s15 + $0x68] sm:$0xff] }
 0x27b   : > { %v1012_v6 = vmul.f32 0.0051020407, %v993_v36  ;;  %v1073_v54 = vmul.f32 %v2806_v4, %v2806_v4 }
 0x27d   : > { %v2818_v42 = vsub.f32 %v2654_v24, %v1012_v6  ;;  %v2821_v20 = vsub.f32 %v2657_v26, %v1012_v6  ;;  %1128 = vadd.xlane.f32.xlu0 %v1127_v16  ;;  %1100 = vadd.xlane.f32.xlu1 %v1099_v3  ;;  %v1123_v24 = vadd.f32 %v1122_v21, %v1068_v22  ;;  %v1130_v40 = vsel %vm933_vm3, %v1073_v54, 0.0  ;;  %v1342_v6 = vld [vmem:[%s2840_s15 + $0x40] sm:$0xff]  ;;  %v1344_v3 = vld [vmem:[%s2840_s15 + $0x50] sm:$0xff] }
 0x27e   : > { %v1072_v26 = vmul.f32 %v2813_v61, %v2813_v61  ;;  %v997_v17 = vpop.xlane.xlu1 %996 }
 0x27f   : > { %v1074_v19 = vmul.f32 %v2818_v42, %v2818_v42  ;;  %v1075_v51 = vmul.f32 %v2821_v20, %v2821_v20  ;;  %v1013_v10 = vmul.f32 0.0051020407, %v997_v17 }
 0x280   : > { %v1131_v41 = vadd.f32 %v1130_v40, %v1072_v26 }
 0x281   : > { %v1134_v25 = vsel %vm933_vm3, %v1075_v51, 0.0  ;;  %1124 = vadd.xlane.f32.xlu1 %v1123_v24  ;;  %v2854_v1 = vsub.f32 %v2664_v30, %v1013_v10  ;;  %v2857_v7 = vsub.f32 %v2661_v28, %v1013_v10  ;;  %v1346_v30 = vld [vmem:[%s2840_s15 + $0x60] sm:$0xff]  ;;  %v1164_v10 = vld [vmem:[%s2872_s18 + $0x30] sm:$0xff] }
 0x282   : > { %v1135_v39 = vadd.f32 %v1134_v25, %v1074_v19 }
 0x283   : > { %v1077_v8 = vmul.f32 %v2854_v1, %v2854_v1  ;;  %v1076_v58 = vmul.f32 %v2857_v7, %v2857_v7 }
 0x284   : > { %1136 = vadd.xlane.f32.xlu0 %v1135_v39 }
 0x285   : > { %1132 = vadd.xlane.f32.xlu1 %v1131_v41  ;;  %v1138_v36 = vsel %vm933_vm3, %v1077_v8, 0.0 }
 0x286   : > { %v1139_v16 = vadd.f32 %v1138_v36, %v1076_v58 }
 0x296   : > { %1352 = vperm.xlu1 %2024, %v1334_v31  }
 0x29a   : > { %1357 = vperm.xlu0 %2025, %v1335_v62   ;;  %1362 = vperm.xlu1 %2024, %v1336_v2   ;;  %v1158_v2 = vld [vmem:[%s2872_s18] sm:$0xff] }
 0x29e   : > { %1367 = vperm.xlu0 %2025, %v1337_v11   ;;  %1372 = vperm.xlu1 %2024, %v1338_v48  }
 0x2a2   : > { %1377 = vperm.xlu0 %2025, %v1339_v5   ;;  %1382 = vperm.xlu1 %2024, %v1340_v59  }
 0x2a6   : > { %1387 = vperm.xlu0 %2025, %v1341_v55  }
 0x2aa   : > { %1397 = vperm.xlu0 %2025, %v1343_v53  }
 0x2ae   : > { %1407 = vperm.xlu0 %2025, %v1345_v56  }
 0x2b2   : > { %1417 = vperm.xlu0 %2025, %v1347_v13  }
 0x2c6   : > { %1140 = vadd.xlane.f32.xlu1 %v1139_v16 }
 0x2d7   : > { %1392 = vperm.xlu1 %2024, %v1342_v6  }
 0x2db   : > { %1402 = vperm.xlu1 %2024, %v1344_v3  }
 0x2df   : > { %1412 = vperm.xlu1 %2024, %v1346_v30  }
 0x2ed   : > { %v1081_v22 = vpop.xlane.xlu0 %1080 }
 0x2ee   : > { %v1142_v28 = vmul.f32 0.0051020407, %v1081_v22 }
 0x2f0   : > { %v1174_v21 = vadd.f32 1e-05, %v1142_v28 }
 0x2f2   : > { %v1105_v54 = vpop.xlane.xlu0 %1104  ;;  %2034 = vrsqrt.f32 %v1174_v21  ;;  %v1159_v21 = vld [vmem:[%s2872_s18 + $0x8] sm:$0xff] }
 0x2f3   : > { %v1148_v19 = vmul.f32 0.0051020407, %v1105_v54 }
 0x2f5   : > { %v1180_v51 = vadd.f32 1e-05, %v1148_v19 }
 0x2f6   : > { %v1089_v24 = vpop.xlane.xlu0 %1088  ;;  %v1085_v26 = vpop.xlane.xlu1 %1084 }
 0x2f7   : > { %2036 = vrsqrt.f32 %v1180_v51  ;;  %v1143_v25 = vmul.f32 0.0051020407, %v1085_v26  ;;  %v1144_v40 = vmul.f32 0.0051020407, %v1089_v24 }
 0x2f9   : > { %v1175_v39 = vadd.f32 1e-05, %v1143_v25  ;;  %v1176_v11 = vadd.f32 1e-05, %v1144_v40  ;;  %v1165_v25 = vld [vmem:[%s2872_s18 + $0x38] sm:$0xff] }
 0x2fa   : > { %v1113_v41 = vpop.xlane.xlu0 %1112  ;;  %v1109_v31 = vpop.xlane.xlu1 %1108 }
 0x2fb   : > { %2038 = vrsqrt.f32 %v1175_v39  ;;  %v1149_v62 = vmul.f32 0.0051020407, %v1109_v31  ;;  %v1150_v48 = vmul.f32 0.0051020407, %v1113_v41 }
 0x2fd   : > { %v1181_v5 = vadd.f32 1e-05, %v1149_v62  ;;  %v1182_v13 = vadd.f32 1e-05, %v1150_v48 }
 0x2fe   : > { %v1093_v59 = vpop.xlane.xlu1 %1092  ;;  %v1097_v53 = vpop.xlane.xlu0 %1096 }
 0x2ff   : > { %v2035_v55 = vpop.eup %2034  ;;  %2040 = vrsqrt.f32 %v1181_v5  ;;  %v1145_v17 = vmul.f32 0.0051020407, %v1093_v59  ;;  %v1146_v16 = vmul.f32 0.0051020407, %v1097_v53  ;;  %v1160_v59 = vld [vmem:[%s2872_s18 + $0x10] sm:$0xff] }
 0x300   : > { %v1206_v56 = vmul.f32 %v2035_v55, %v1158_v2  ;;  %2042 = vrsqrt.f32 %v1176_v11 }
 0x301   : > { %2044 = vrsqrt.f32 %v1182_v13  ;;  %v1177_v3 = vadd.f32 1e-05, %v1145_v17  ;;  %v1178_v19 = vadd.f32 1e-05, %v1146_v16 }
 0x302   : > { %v1117_v8 = vpop.xlane.xlu1 %1116  ;;  %1224 = vperm.xlu0 %2025, %v1206_v56   ;;  %v1121_v22 = vpop.xlane.xlu0 %1120 }
 0x303   : > { %v1151_v36 = vmul.f32 0.0051020407, %v1117_v8  ;;  %v1152_v51 = vmul.f32 0.0051020407, %v1121_v22 }
 0x304   : > { %v2037_v58 = vpop.eup %2036 }
 0x305   : > { %v1212_v6 = vmul.f32 %v2037_v58, %v1164_v10  ;;  %v1183_v30 = vadd.f32 1e-05, %v1151_v36  ;;  %v1184_v41 = vadd.f32 1e-05, %v1152_v51  ;;  %v1166_v58 = vld [vmem:[%s2872_s18 + $0x40] sm:$0xff]  ;;  %v1167_v36 = vld [vmem:[%s2872_s18 + $0x48] sm:$0xff] }
 0x306   : > { %v1101_v28 = vpop.xlane.xlu1 %1100  ;;  %v1129_v31 = vpop.xlane.xlu0 %1128 }
 0x307   : > { %1254 = vperm.xlu1 %2024, %v1212_v6   ;;  %2046 = vrsqrt.f32 %v1183_v30  ;;  %v1147_v62 = vmul.f32 0.0051020407, %v1101_v28  ;;  %v1154_v53 = vmul.f32 0.0051020407, %v1129_v31  ;;  %v1168_v31 = vld [vmem:[%s2872_s18 + $0x50] sm:$0xff] }
 0x308   : > { %v2039_v54 = vpop.eup %2038  ;;  %2048 = vrsqrt.f32 %v1177_v3 }
 0x309   : > { %v1207_v24 = vmul.f32 %v2039_v54, %v1159_v21  ;;  %2050 = vrsqrt.f32 %v1178_v19  ;;  %v1179_v56 = vadd.f32 1e-05, %v1147_v62  ;;  %v1186_v6 = vadd.f32 1e-05, %v1154_v53  ;;  %v1161_v21 = vld [vmem:[%s2872_s18 + $0x18] sm:$0xff]  ;;  %v1171_v62 = vld [vmem:[%s2872_s18 + $0x68] sm:$0xff] }
 0x30a   : > { %v1125_v26 = vpop.xlane.xlu1 %1124 }
 0x30b   : > { %v1153_v40 = vmul.f32 0.0051020407, %v1125_v26  ;;  %1229 = vperm.xlu1 %2024, %v1207_v24   ;;  %v1162_v24 = vld [vmem:[%s2872_s18 + $0x20] sm:$0xff]  ;;  %v1169_v26 = vld [vmem:[%s2872_s18 + $0x58] sm:$0xff] }
 0x30c   : > { %v2041_v39 = vpop.eup %2040 }
 0x30d   : > { %v1185_v2 = vadd.f32 1e-05, %v1153_v40  ;;  %v1213_v11 = vmul.f32 %v2041_v39, %v1165_v25  ;;  %v2043_v48 = vpop.eup %2042  ;;  %v1137_v8 = vpop.xlane.xlu0 %1136 }
 0x30e   : > { %v1133_v5 = vpop.xlane.xlu1 %1132  ;;  %v1208_v17 = vmul.f32 %v2043_v48, %v1160_v59  ;;  %v2045_v10 = vpop.eup %2044  ;;  %v1156_v3 = vmul.f32 0.0051020407, %v1137_v8  ;;  %v1163_v59 = vld [vmem:[%s2872_s18 + $0x28] sm:$0xff] }
 0x30f   : > { %2052 = vrsqrt.f32 %v1185_v2  ;;  %v1155_v55 = vmul.f32 0.0051020407, %v1133_v5  ;;  %1259 = vperm.xlu1 %2024, %v1213_v11   ;;  %v1214_v30 = vmul.f32 %v2045_v10, %v1166_v58  ;;  %v1172_v10 = vld [vmem:[%s2872_s18 + $0x70] sm:$0xff] }
 0x310   : > { %2054 = vrsqrt.f32 %v1184_v41  ;;  %v1188_v19 = vadd.f32 1e-05, %v1156_v3  ;;  %v1348_v58 = vld [vmem:[%s2840_s15 + $0x70] sm:$0xff] }
 0x311   : > { %v1187_v13 = vadd.f32 1e-05, %v1155_v55 }
 0x313   : > { %2056 = vrsqrt.f32 %v1187_v13  ;;  %1234 = vperm.xlu1 %2024, %v1208_v17  }
 0x314   : > { %v2047_v16 = vpop.eup %2046  ;;  %2058 = vrsqrt.f32 %v1179_v56  ;;  %v1170_v56 = vld [vmem:[%s2872_s18 + $0x60] sm:$0xff] }
 0x315   : > { %v1215_v22 = vmul.f32 %v2047_v16, %v1167_v36  ;;  %v2049_v28 = vpop.eup %2048  ;;  %2060 = vrsqrt.f32 %v1186_v6  ;;  %v1353_v36 = vpop.permute.xlu1 %1352 }
 0x316   : > { %v2051_v54 = vpop.eup %2050  ;;  %v1209_v51 = vmul.f32 %v2049_v28, %v1161_v21  ;;  %2062 = vrsqrt.f32 %v1188_v19  ;;  %v1358_v21 = vpop.permute.xlu0 %1357  ;;  %v1173_v19 = vld [vmem:[%s2872_s18 + $0x78] sm:$0xff] }
 0x317   : > { %1264 = vperm.xlu1 %2024, %v1214_v30   ;;  %1269 = vperm.xlu0 %2025, %v1215_v22   ;;  %v1210_v40 = vmul.f32 %v2051_v54, %v1162_v24 }
 0x319   : > { %v2890_v16 = vpop.permute.xlu1 %1362 }
 0x31a   : > { %v2894_v54 = vpop.permute.xlu0 %1367 }
 0x31b   : > { %1239 = vperm.xlu1 %2024, %v1209_v51  }
 0x31c   : > { %v2053_v25 = vpop.eup %2052 }
 0x31d   : > { %v1217_v39 = vmul.f32 %v2053_v25, %v1169_v26  ;;  %v2055_v41 = vpop.eup %2054  ;;  %v2892_v6 = vpop.permute.xlu1 %1372  ;;  %v1349_v25 = vld [vmem:[%s2840_s15 + $0x78] sm:$0xff] }
 0x31e   : > { %v1216_v11 = vmul.f32 %v2055_v41, %v1168_v31  ;;  %v2897_v51 = vpop.permute.xlu0 %1377 }
 0x31f   : > { %1244 = vperm.xlu1 %2024, %v1210_v40   ;;  %1279 = vperm.xlu0 %2025, %v1217_v39  }
 0x320   : > { %v2057_v2 = vpop.eup %2056 }
 0x321   : > { %v1219_v48 = vmul.f32 %v2057_v2, %v1171_v62  ;;  %v2059_v5 = vpop.eup %2058  ;;  %v1383_v3 = vpop.permute.xlu1 %1382 }
 0x322   : > { %v1211_v55 = vmul.f32 %v2059_v5, %v1163_v59  ;;  %v2061_v53 = vpop.eup %2060  ;;  %v1388_v40 = vpop.permute.xlu0 %1387 }
 0x323   : > { %1274 = vperm.xlu1 %2024, %v1216_v11   ;;  %1289 = vperm.xlu0 %2025, %v1219_v48   ;;  %v1218_v13 = vmul.f32 %v2061_v53, %v1170_v56  ;;  %v2063_v17 = vpop.eup %2062  ;;  %v1463_v53 = vld [vmem:[%s2916_s25 + $0x8] sm:$0xff] }
 0x324   : > { %v1220_v8 = vmul.f32 %v2063_v17, %v1172_v10 }
 0x326   : > { %v2900_v39 = vpop.permute.xlu0 %1397 }
 0x327   : > { %1249 = vperm.xlu1 %2024, %v1211_v55   ;;  %v1462_v55 = vld [vmem:[%s2916_s25] sm:$0xff] }
 0x32a   : > { %v2904_v31 = vpop.permute.xlu0 %1407 }
 0x32b   : > { %1284 = vperm.xlu1 %2024, %v1218_v13  }
 0x32e   : > { %v2908_v2 = vpop.permute.xlu0 %1417 }
 0x32f   : > { %1294 = vperm.xlu1 %2024, %v1220_v8  }
 0x333   : > { %1422 = vperm.xlu1 %2024, %v1348_v58  }
 0x34f   : > { %v1141_v30 = vpop.xlane.xlu1 %1140 }
 0x350   : > { %v1157_v22 = vmul.f32 0.0051020407, %v1141_v30 }
 0x352   : > { %v1189_v28 = vadd.f32 1e-05, %v1157_v22  ;;  %v1474_v22 = vld [vmem:[%s2916_s25 + $0x60] sm:$0xff] }
 0x353   : > { %v2902_v41 = vpop.permute.xlu1 %1392 }
 0x354   : > { %2064 = vrsqrt.f32 %v1189_v28  ;;  %v1475_v28 = vld [vmem:[%s2916_s25 + $0x68] sm:$0xff] }
 0x357   : > { %v2906_v62 = vpop.permute.xlu1 %1402 }
 0x35b   : > { %v2918_v11 = vpop.permute.xlu1 %1412 }
 0x361   : > { %v2065_v24 = vpop.eup %2064 }
 0x362   : > { %v1221_v26 = vmul.f32 %v2065_v24, %v1173_v19 }
 0x364   : > { %1299 = vperm.xlu0 %2025, %v1221_v26   ;;  %v1464_v26 = vld [vmem:[%s2916_s25 + $0x10] sm:$0xff] }
 0x368   : > { %1427 = vperm.xlu0 %2025, %v1349_v25   ;;  %v1465_v25 = vld [vmem:[%s2916_s25 + $0x18] sm:$0xff] }
 0x37d   : > { %v1225_v48 = vpop.permute.xlu0 %1224 }
 0x37e   : > { %v1302_v5 = vmul.f32 %v1225_v48, %v2670_v44  ;;  %v1303_v59 = vmul.f32 %v1225_v48, %v2673_v47 }
 0x380   : > { %v1430_v56 = vadd.f32 %v1353_v36, %v1302_v5  ;;  %v1431_v13 = vadd.f32 %v1353_v36, %v1303_v59 }
 0x382   : > { %v1255_v17 = vpop.permute.xlu1 %1254  ;;  %v1494_v10 = vadd.f32 %v1462_v55, %v1430_v56  ;;  %v1495_v8 = vadd.f32 %v1463_v53, %v1431_v13  ;;  %v1476_v56 = vld [vmem:[%s2916_s25 + $0x70] sm:$0xff] }
 0x383   : > { %v1314_v58 = vmul.f32 %v1255_v17, %v2680_v60  ;;  %v1315_v30 = vmul.f32 %v1255_v17, %v2683_v63 }
 0x384   : > { %1526 = vst [vmem:[%s2928_s27] sm:$0xff] %v1494_v10  ;;  %1527 = vst.msk [vmem:[%s2928_s27 + $0x8] sm:$0xff] %vm933_vm3, %v1495_v8 }
 0x385   : > { %v1442_v44 = vadd.f32 %v1383_v3, %v1314_v58  ;;  %v1443_v47 = vadd.f32 %v1383_v3, %v1315_v30 }
 0x386   : > { %v1230_v19 = vpop.permute.xlu1 %1229 }
 0x387   : > { %v1506_v36 = vadd.f32 %v1474_v22, %v1442_v44  ;;  %v1507_v60 = vadd.f32 %v1475_v28, %v1443_v47  ;;  %v1304_v63 = vmul.f32 %v1230_v19, %v2694_v12  ;;  %v1305_v24 = vmul.f32 %v1230_v19, %v2697_v38  ;;  %v1477_v38 = vld [vmem:[%s2916_s25 + $0x78] sm:$0xff]  ;;  %v1467_v22 = vld [vmem:[%s2916_s25 + $0x28] sm:$0xff] }
 0x388   : > { %v1481_v19 = vld [vmem:[%s2916_s25 + $0x98] sm:$0xff] }
 0x389   : > { %1538 = vst [vmem:[%s2928_s27 + $0x60] sm:$0xff] %v1506_v36  ;;  %1539 = vst.msk [vmem:[%s2928_s27 + $0x68] sm:$0xff] %vm933_vm3, %v1507_v60  ;;  %v1432_v48 = vadd.f32 %v1358_v21, %v1304_v63  ;;  %v1433_v5 = vadd.f32 %v1358_v21, %v1305_v24  ;;  %v1480_v60 = vld [vmem:[%s2916_s25 + $0x90] sm:$0xff] }
 0x38a   : > { %v1260_v59 = vpop.permute.xlu1 %1259 }
 0x38b   : > { %v1496_v3 = vadd.f32 %v1464_v26, %v1432_v48  ;;  %v1497_v55 = vadd.f32 %v1465_v25, %v1433_v5  ;;  %v1316_v53 = vmul.f32 %v1260_v59, %v2709_v43  ;;  %v1317_v12 = vmul.f32 %v1260_v59, %v2689_v9  ;;  %v1466_v43 = vld [vmem:[%s2916_s25 + $0x20] sm:$0xff]  ;;  %v1479_v25 = vld [vmem:[%s2916_s25 + $0x88] sm:$0xff] }
 0x38d   : > { %1528 = vst [vmem:[%s2928_s27 + $0x10] sm:$0xff] %v1496_v3  ;;  %1529 = vst.msk [vmem:[%s2928_s27 + $0x18] sm:$0xff] %vm933_vm3, %v1497_v55  ;;  %v1444_v13 = vadd.f32 %v1388_v40, %v1316_v53  ;;  %v1445_v17 = vadd.f32 %v1388_v40, %v1317_v12  ;;  %v1469_v12 = vld [vmem:[%s2916_s25 + $0x38] sm:$0xff] }
 0x38e   : > { %v1235_v10 = vpop.permute.xlu1 %1234 }
 0x38f   : > { %v1508_v21 = vadd.f32 %v1476_v56, %v1444_v13  ;;  %v1509_v8 = vadd.f32 %v1477_v38, %v1445_v17  ;;  %v1306_v58 = vmul.f32 %v1235_v10, %v2700_v14  ;;  %v1307_v30 = vmul.f32 %v1235_v10, %v2703_v15 }
 0x391   : > { %1540 = vst [vmem:[%s2928_s27 + $0x70] sm:$0xff] %v1508_v21  ;;  %1541 = vst.msk [vmem:[%s2928_s27 + $0x78] sm:$0xff] %vm933_vm3, %v1509_v8  ;;  %v1434_v9 = vadd.f32 %v2890_v16, %v1306_v58  ;;  %v1435_v40 = vadd.f32 %v2890_v16, %v1307_v30  ;;  %v1484_v21 = vld [vmem:[%s2916_s25 + $0xb0] sm:$0xff]  ;;  %v1485_v8 = vld [vmem:[%s2916_s25 + $0xb8] sm:$0xff] }
 0x392   : > { %v1270_v28 = vpop.permute.xlu0 %1269  ;;  %v1265_v44 = vpop.permute.xlu1 %1264 }
 0x393   : > { %v1498_v47 = vadd.f32 %v1466_v43, %v1434_v9  ;;  %v1499_v36 = vadd.f32 %v1467_v22, %v1435_v40  ;;  %v1320_v14 = vmul.f32 %v1270_v28, %v2758_v18  ;;  %v1321_v15 = vmul.f32 %v1270_v28, %v2742_v57  ;;  %v1478_v18 = vld [vmem:[%s2916_s25 + $0x80] sm:$0xff] }
 0x394   : > { %v1318_v63 = vmul.f32 %v1265_v44, %v2718_v27  ;;  %v1319_v24 = vmul.f32 %v1265_v44, %v2721_v29  ;;  %v1470_v22 = vld [vmem:[%s2916_s25 + $0x40] sm:$0xff] }
 0x395   : > { %1530 = vst [vmem:[%s2928_s27 + $0x20] sm:$0xff] %v1498_v47  ;;  %1531 = vst.msk [vmem:[%s2928_s27 + $0x28] sm:$0xff] %vm933_vm3, %v1499_v36  ;;  %v1448_v16 = vadd.f32 %v2900_v39, %v1320_v14  ;;  %v1449_v26 = vadd.f32 %v2900_v39, %v1321_v15  ;;  %v1468_v39 = vld [vmem:[%s2916_s25 + $0x30] sm:$0xff]  ;;  %v1489_v15 = vld [vmem:[%s2916_s25 + $0xd8] sm:$0xff] }
 0x396   : > { %v1446_v57 = vadd.f32 %v2902_v41, %v1318_v63  ;;  %v1447_v27 = vadd.f32 %v2902_v41, %v1319_v24  ;;  %v1240_v29 = vpop.permute.xlu1 %1239  ;;  %v1488_v14 = vld [vmem:[%s2916_s25 + $0xd0] sm:$0xff] }
 0x397   : > { %v1512_v48 = vadd.f32 %v1480_v60, %v1448_v16  ;;  %v1513_v5 = vadd.f32 %v1481_v19, %v1449_v26  ;;  %v1308_v59 = vmul.f32 %v1240_v29, %v2729_v33  ;;  %v1309_v3 = vmul.f32 %v1240_v29, %v2724_v32  ;;  %v1473_v29 = vld [vmem:[%s2916_s25 + $0x58] sm:$0xff] }
 0x398   : > { %v1510_v55 = vadd.f32 %v1478_v18, %v1446_v57  ;;  %v1511_v53 = vadd.f32 %v1479_v25, %v1447_v27  ;;  %v1472_v27 = vld [vmem:[%s2916_s25 + $0x50] sm:$0xff] }
 0x399   : > { %1544 = vst [vmem:[%s2928_s27 + $0x90] sm:$0xff] %v1512_v48  ;;  %1545 = vst.msk [vmem:[%s2928_s27 + $0x98] sm:$0xff] %vm933_vm3, %v1513_v5  ;;  %v1436_v41 = vadd.f32 %v2894_v54, %v1308_v59  ;;  %v1437_v56 = vadd.f32 %v2894_v54, %v1309_v3 }
 0x39a   : > { %1542 = vst [vmem:[%s2928_s27 + $0x80] sm:$0xff] %v1510_v55  ;;  %1543 = vst.msk [vmem:[%s2928_s27 + $0x88] sm:$0xff] %vm933_vm3, %v1511_v53  ;;  %v1280_v32 = vpop.permute.xlu0 %1279  ;;  %v1245_v33 = vpop.permute.xlu1 %1244  ;;  %v1486_v55 = vld [vmem:[%s2916_s25 + $0xc0] sm:$0xff]  ;;  %v1487_v53 = vld [vmem:[%s2916_s25 + $0xc8] sm:$0xff] }
 0x39b   : > { %v1500_v38 = vadd.f32 %v1468_v39, %v1436_v41  ;;  %v1501_v13 = vadd.f32 %v1469_v12, %v1437_v56  ;;  %v1324_v17 = vmul.f32 %v1280_v32, %v2801_v37  ;;  %v1325_v10 = vmul.f32 %v1280_v32, %v2791_v52  ;;  %v1471_v37 = vld [vmem:[%s2916_s25 + $0x48] sm:$0xff]  ;;  %v1490_v32 = vld [vmem:[%s2916_s25 + $0xe0] sm:$0xff] }
 0x39c   : > { %v1310_v58 = vmul.f32 %v1245_v33, %v2745_v35  ;;  %v1311_v30 = vmul.f32 %v1245_v33, %v2748_v0  ;;  %v1491_v33 = vld [vmem:[%s2916_s25 + $0xe8] sm:$0xff] }
 0x39d   : > { %1532 = vst [vmem:[%s2928_s27 + $0x30] sm:$0xff] %v1500_v38  ;;  %1533 = vst.msk [vmem:[%s2928_s27 + $0x38] sm:$0xff] %vm933_vm3, %v1501_v13  ;;  %v1452_v54 = vadd.f32 %v2904_v31, %v1324_v17  ;;  %v1453_v43 = vadd.f32 %v2904_v31, %v1325_v10 }
 0x39e   : > { %v1438_v52 = vadd.f32 %v2892_v6, %v1310_v58  ;;  %v1439_v9 = vadd.f32 %v2892_v6, %v1311_v30  ;;  %v1290_v35 = vpop.permute.xlu0 %1289  ;;  %v1275_v0 = vpop.permute.xlu1 %1274  ;;  %v1493_v30 = vld [vmem:[%s2916_s25 + $0xf8] sm:$0xff] }
 0x39f   : > { %v1516_v40 = vadd.f32 %v1484_v21, %v1452_v54  ;;  %v1517_v28 = vadd.f32 %v1485_v8, %v1453_v43  ;;  %v1328_v44 = vmul.f32 %v1290_v35, %v2813_v61  ;;  %v1329_v31 = vmul.f32 %v1290_v35, %v2806_v4  ;;  %v1482_v61 = vld [vmem:[%s2916_s25 + $0xa0] sm:$0xff]  ;;  %v1483_v4 = vld [vmem:[%s2916_s25 + $0xa8] sm:$0xff] }
 0x3a0   : > { %v1502_v47 = vadd.f32 %v1470_v22, %v1438_v52  ;;  %v1503_v36 = vadd.f32 %v1471_v37, %v1439_v9  ;;  %v1322_v60 = vmul.f32 %v1275_v0, %v2765_v23  ;;  %v1323_v6 = vmul.f32 %v1275_v0, %v2768_v34 }
 0x3a1   : > { %1548 = vst [vmem:[%s2928_s27 + $0xb0] sm:$0xff] %v1516_v40  ;;  %1549 = vst.msk [vmem:[%s2928_s27 + $0xb8] sm:$0xff] %vm933_vm3, %v1517_v28  ;;  %v1456_v19 = vadd.f32 %v2908_v2, %v1328_v44  ;;  %v1457_v63 = vadd.f32 %v2908_v2, %v1329_v31 }
 0x3a2   : > { %1534 = vst [vmem:[%s2928_s27 + $0x40] sm:$0xff] %v1502_v47  ;;  %1535 = vst.msk [vmem:[%s2928_s27 + $0x48] sm:$0xff] %vm933_vm3, %v1503_v36  ;;  %v1450_v23 = vadd.f32 %v2906_v62, %v1322_v60  ;;  %v1451_v34 = vadd.f32 %v2906_v62, %v1323_v6  ;;  %v1250_v24 = vpop.permute.xlu1 %1249 }
 0x3a3   : > { %v1520_v16 = vadd.f32 %v1488_v14, %v1456_v19  ;;  %v1521_v26 = vadd.f32 %v1489_v15, %v1457_v63  ;;  %v1312_v18 = vmul.f32 %v1250_v24, %v2777_v46  ;;  %v1313_v2 = vmul.f32 %v1250_v24, %v2771_v45 }
 0x3a4   : > { %v1514_v25 = vadd.f32 %v1482_v61, %v1450_v23  ;;  %v1515_v57 = vadd.f32 %v1483_v4, %v1451_v34 }
 0x3a5   : > { %1552 = vst [vmem:[%s2928_s27 + $0xd0] sm:$0xff] %v1520_v16  ;;  %1553 = vst.msk [vmem:[%s2928_s27 + $0xd8] sm:$0xff] %vm933_vm3, %v1521_v26  ;;  %v1440_v62 = vadd.f32 %v2897_v51, %v1312_v18  ;;  %v1441_v48 = vadd.f32 %v2897_v51, %v1313_v2 }
 0x3a6   : > { %1546 = vst [vmem:[%s2928_s27 + $0xa0] sm:$0xff] %v1514_v25  ;;  %1547 = vst.msk [vmem:[%s2928_s27 + $0xa8] sm:$0xff] %vm933_vm3, %v1515_v57  ;;  %v1285_v45 = vpop.permute.xlu1 %1284 }
 0x3a7   : > { %v1504_v46 = vadd.f32 %v1472_v27, %v1440_v62  ;;  %v1505_v5 = vadd.f32 %v1473_v29, %v1441_v48  ;;  %v1326_v59 = vmul.f32 %v1285_v45, %v2785_v49  ;;  %v1327_v3 = vmul.f32 %v1285_v45, %v2788_v50 }
 0x3a9   : > { %1536 = vst [vmem:[%s2928_s27 + $0x50] sm:$0xff] %v1504_v46  ;;  %1537 = vst.msk [vmem:[%s2928_s27 + $0x58] sm:$0xff] %vm933_vm3, %v1505_v5  ;;  %v1454_v51 = vadd.f32 %v2918_v11, %v1326_v59  ;;  %v1455_v39 = vadd.f32 %v2918_v11, %v1327_v3 }
 0x3aa   : > { %v1295_v12 = vpop.permute.xlu1 %1294 }
 0x3ab   : > { %v1518_v41 = vadd.f32 %v1486_v55, %v1454_v51  ;;  %v1519_v56 = vadd.f32 %v1487_v53, %v1455_v39  ;;  %v1330_v49 = vmul.f32 %v1295_v12, %v2818_v42  ;;  %v1331_v50 = vmul.f32 %v1295_v12, %v2821_v20  ;;  %v1492_v42 = vld [vmem:[%s2916_s25 + $0xf0] sm:$0xff] }
 0x3ad   : > { %1550 = vst [vmem:[%s2928_s27 + $0xc0] sm:$0xff] %v1518_v41  ;;  %1551 = vst.msk [vmem:[%s2928_s27 + $0xc8] sm:$0xff] %vm933_vm3, %v1519_v56 }
 0x3ae   : > { %v1423_v38 = vpop.permute.xlu1 %1422 }
 0x3af   : > { %v1458_v13 = vadd.f32 %v1423_v38, %v1330_v49  ;;  %v1459_v17 = vadd.f32 %v1423_v38, %v1331_v50 }
 0x3b1   : > { %v1522_v11 = vadd.f32 %v1490_v32, %v1458_v13  ;;  %v1523_v10 = vadd.f32 %v1491_v33, %v1459_v17 }
 0x3b3   : > { %1554 = vst [vmem:[%s2928_s27 + $0xe0] sm:$0xff] %v1522_v11  ;;  %1555 = vst.msk [vmem:[%s2928_s27 + $0xe8] sm:$0xff] %vm933_vm3, %v1523_v10 }
 0x3df   : > { %v1300_v21 = vpop.permute.xlu0 %1299 }
 0x3e0   : > { %v1332_v8 = vmul.f32 %v1300_v21, %v2857_v7  ;;  %v1333_v58 = vmul.f32 %v1300_v21, %v2854_v1 }
 0x3e3   : > { %v1428_v20 = vpop.permute.xlu0 %1427 }
 0x3e4   : > { %v1460_v54 = vadd.f32 %v1428_v20, %v1332_v8  ;;  %v1461_v43 = vadd.f32 %v1428_v20, %v1333_v58  ;;  %1564 = sbr.rel (!%p2226_p4) target bundleno = 1049 (0x419), region = 56 }
 0x3e6   : > { %v1524_v22 = vadd.f32 %v1492_v42, %v1460_v54  ;;  %v1525_v37 = vadd.f32 %v1493_v30, %v1461_v43 }
 0x3e8   : > { %1556 = vst [vmem:[%s2928_s27 + $0xf0] sm:$0xff] %v1524_v22  ;;  %1557 = vst.msk [vmem:[%s2928_s27 + $0xf8] sm:$0xff] %vm933_vm3, %v1525_v37 }
 0x3e9   : > { %s3216_s23 = smov (!%p1567_p8, %s1566_s23), 16 }
 0x3ea   : > { %s1871_s14 = sshll.u32 %s3216_s23, 8 }
 0x3eb   : > { %p1857_p9 = scmp.eq.s32.totalorder %s1871_s14, 0 }
 0x3ec   : > { %s3067_s15 = sshrl.u32 (!%p1857_p9), %s3216_s23, 4 }
 0x3ed   : > { %1577 = sbr.rel (%p1857_p9) target bundleno = 1049 (0x419), region = 60  ;;  %p1858_p10 = scmp.le.s32.totalorder (!%p1857_p9), %s3067_s15, 0 }
 0x3f2   : > { %1752 = sbr.rel (%p1858_p10) target bundleno = 1032 (0x408), region = 117  ;;  %s3207_s30 = smov (!%p1858_p10), %s3061_s11 }
 0x3f3   : > { %s3208_s13 = smov (!%p1858_p10), %s2928_s27  ;;  %s3076_s22 = smov (!%p1858_p10), 0  }
 0x3f4   : > { %s3078_s16 = smov (!%p1858_p10), 0  }
 0x3f7 LB: >> { %v1590_v1 = vld [vmem:[%s2128_s13] sm:$0xff]  ;;  %v1592_v7 = vld [vmem:[%s2128_s13 + $0x10] sm:$0xff]  ;;  %s1654_s17 = sadd.s32 1, %s2132_s22  ;;  %v1622_v19 = vld [vmem:[%s2128_s13 + $0x8] sm:$0xff]  ;;  %s1584_s16 = sadd.s32 1, %s2136_s16   ;;  %s2136_s16 = sphi %s3078_s16, %s1584_s16   ;;  %s2132_s22 = sphi %s3076_s22, %s3211_s22   ;;  %s2128_s13 = sphi %s3208_s13, %s3210_s13   ;;  %s2124_s30 = sphi %s3207_s30, %s3209_s30  }
 0x3f8   : >> { %v1594_v52 = vld [vmem:[%s2128_s13 + $0x20] sm:$0xff]  ;;  %1591 = vst [vmem:[%s2124_s30] sm:$0xff] %v1590_v1  ;;  %1593 = vst [vmem:[%s2124_s30 + $0x10] sm:$0xff] %v1592_v7  ;;  %v1596_v9 = vld [vmem:[%s2128_s13 + $0x30] sm:$0xff]  ;;  %p1655_p11 = scmp.ge.s32.totalorder %s1654_s17, %s3067_s15  ;;  %p1583_p12 = scmp.ge.s32.totalorder %s1584_s16, %s3067_s15 }
 0x3f9   : >> { %1595 = vst [vmem:[%s2124_s30 + $0x20] sm:$0xff] %v1594_v52  ;;  %v1598_v35 = vld [vmem:[%s2128_s13 + $0x40] sm:$0xff]  ;;  %v1600_v0 = vld [vmem:[%s2128_s13 + $0x50] sm:$0xff]  ;;  %1597 = vst [vmem:[%s2124_s30 + $0x30] sm:$0xff] %v1596_v9 }
 0x3fa   : >> { %1599 = vst [vmem:[%s2124_s30 + $0x40] sm:$0xff] %v1598_v35  ;;  %1601 = vst [vmem:[%s2124_s30 + $0x50] sm:$0xff] %v1600_v0  ;;  %v1602_v40 = vld [vmem:[%s2128_s13 + $0x60] sm:$0xff]  ;;  %v1604_v28 = vld [vmem:[%s2128_s13 + $0x70] sm:$0xff]  ;;  %s3218_s17 = smov (%p1655_p11, %s1654_s17), 0 }
 0x3fb   : >> { %v1606_v44 = vld [vmem:[%s2128_s13 + $0x80] sm:$0xff]  ;;  %1603 = vst [vmem:[%s2124_s30 + $0x60] sm:$0xff] %v1602_v40  ;;  %1605 = vst [vmem:[%s2124_s30 + $0x70] sm:$0xff] %v1604_v28  ;;  %v1608_v31 = vld [vmem:[%s2128_s13 + $0x90] sm:$0xff]  ;;  %s1859_s18 = sshll.u32 %s3218_s17, 8  ;;  %s3211_s22 = smov %s3218_s17 }
 0x3fc   : >> { %1607 = vst [vmem:[%s2124_s30 + $0x80] sm:$0xff] %v1606_v44  ;;  %v1610_v47 = vld [vmem:[%s2128_s13 + $0xa0] sm:$0xff]  ;;  %v1612_v36 = vld [vmem:[%s2128_s13 + $0xb0] sm:$0xff]  ;;  %1609 = vst [vmem:[%s2124_s30 + $0x90] sm:$0xff] %v1608_v31  ;;  %s3134_s19 = scalar_lea.vmem %s2928_s27, %s1859_s18 [#allocation2]   ;;  %s1660_s20 = scalar_lea.vmem %s3061_s11, %s1859_s18  }
 0x3fd   : >> { %1611 = vst [vmem:[%s2124_s30 + $0xa0] sm:$0xff] %v1610_v47  ;;  %1613 = vst [vmem:[%s2124_s30 + $0xb0] sm:$0xff] %v1612_v36  ;;  %v1614_v14 = vld [vmem:[%s2128_s13 + $0xc0] sm:$0xff]  ;;  %v1616_v15 = vld [vmem:[%s2128_s13 + $0xd0] sm:$0xff] }
 0x3fe   : >> { %v1618_v60 = vld [vmem:[%s2128_s13 + $0xe0] sm:$0xff]  ;;  %1615 = vst [vmem:[%s2124_s30 + $0xc0] sm:$0xff] %v1614_v14  ;;  %1617 = vst [vmem:[%s2124_s30 + $0xd0] sm:$0xff] %v1616_v15  ;;  %v1620_v6 = vld [vmem:[%s2128_s13 + $0xf0] sm:$0xff] }
 0x3ff   : >> { %1619 = vst [vmem:[%s2124_s30 + $0xe0] sm:$0xff] %v1618_v60  ;;  %v1624_v63 = vld [vmem:[%s2128_s13 + $0x18] sm:$0xff]  ;;  %1621 = vst [vmem:[%s2124_s30 + $0xf0] sm:$0xff] %v1620_v6  ;;  %v1626_v61 = vld [vmem:[%s2128_s13 + $0x28] sm:$0xff] }
 0x400   : >> { %1623 = vst [vmem:[%s2124_s30 + $0x8] sm:$0xff] %v1622_v19  ;;  %1625 = vst [vmem:[%s2124_s30 + $0x18] sm:$0xff] %v1624_v63  ;;  %v1628_v4 = vld [vmem:[%s2128_s13 + $0x38] sm:$0xff]  ;;  %v1630_v23 = vld [vmem:[%s2128_s13 + $0x48] sm:$0xff] }
 0x401   : >> { %1627 = vst [vmem:[%s2124_s30 + $0x28] sm:$0xff] %v1626_v61  ;;  %1629 = vst [vmem:[%s2124_s30 + $0x38] sm:$0xff] %v1628_v4  ;;  %v1632_v34 = vld [vmem:[%s2128_s13 + $0x58] sm:$0xff]  ;;  %v1634_v24 = vld [vmem:[%s2128_s13 + $0x68] sm:$0xff] }
 0x402   : >> { %1631 = vst [vmem:[%s2124_s30 + $0x48] sm:$0xff] %v1630_v23  ;;  %v1636_v16 = vld [vmem:[%s2128_s13 + $0x78] sm:$0xff]  ;;  %1633 = vst [vmem:[%s2124_s30 + $0x58] sm:$0xff] %v1632_v34  ;;  %v1638_v26 = vld [vmem:[%s2128_s13 + $0x88] sm:$0xff] }
 0x403   : >> { %1635 = vst [vmem:[%s2124_s30 + $0x68] sm:$0xff] %v1634_v24  ;;  %1637 = vst [vmem:[%s2124_s30 + $0x78] sm:$0xff] %v1636_v16  ;;  %v1640_v18 = vld [vmem:[%s2128_s13 + $0x98] sm:$0xff]  ;;  %v1642_v2 = vld [vmem:[%s2128_s13 + $0xa8] sm:$0xff]  ;;  %1586 = sbr.rel (!%p1583_p12) target bundleno = 1015 (0x3f7), region = 123 }
 0x404   : >> { %1639 = vst [vmem:[%s2124_s30 + $0x88] sm:$0xff] %v1638_v26  ;;  %1641 = vst [vmem:[%s2124_s30 + $0x98] sm:$0xff] %v1640_v18  ;;  %v1644_v25 = vld [vmem:[%s2128_s13 + $0xb8] sm:$0xff]  ;;  %v1646_v57 = vld [vmem:[%s2128_s13 + $0xc8] sm:$0xff] }
 0x405   : >> { %1643 = vst [vmem:[%s2124_s30 + $0xa8] sm:$0xff] %v1642_v2  ;;  %v1648_v27 = vld [vmem:[%s2128_s13 + $0xd8] sm:$0xff]  ;;  %1645 = vst [vmem:[%s2124_s30 + $0xb8] sm:$0xff] %v1644_v25  ;;  %v1650_v29 = vld [vmem:[%s2128_s13 + $0xe8] sm:$0xff] }
 0x406   : >> { %1647 = vst [vmem:[%s2124_s30 + $0xc8] sm:$0xff] %v1646_v57  ;;  %1649 = vst [vmem:[%s2124_s30 + $0xd8] sm:$0xff] %v1648_v27  ;;  %v1652_v62 = vld [vmem:[%s2128_s13 + $0xf8] sm:$0xff]  ;;  %s3210_s13 = smov %s3134_s19 }
 0x407   : >> { %1651 = vst [vmem:[%s2124_s30 + $0xe8] sm:$0xff] %v1650_v29  ;;  %1653 = vst [vmem:[%s2124_s30 + $0xf8] sm:$0xff] %v1652_v62  ;;  %s3209_s30 = smov %s1660_s20 }
 0x408 PF: > { %s3175_s21 = sand.u32 15, %s3216_s23   ;;  %s1874_s25 = sshll.u32 %s3067_s15, 8 }
 0x409   : > { %s3179_s26 = scalar_lea.vmem %s2928_s27, %s1874_s25 [#allocation2]   ;;  %s1667_s24 = scalar_lea.vmem %s3061_s11, %s1874_s25  }
 0x40a   : > { %p1864_p13 = scmp.le.s32.totalorder %s3175_s21, 0 }
 0x40b   : > { %s2138_s29 = smov (!%p1864_p13), %s1667_s24   ;;  %s2142_s10 = smov (!%p1864_p13), %s3179_s26  }
 0x40c   : > { %1766 = sbr.rel (%p1864_p13) target bundleno = 1049 (0x419), region = 128  ;;  %s2146_s14 = smov (!%p1864_p13), 0  }
 0x40d   : > { %s2150_s16 = smov (!%p1864_p13), 0  }
 0x411 LB: >> { %v1677_v48 = vld [vmem:[%s2144_s10] sm:$0xff]  ;;  %v1679_v45 = vld [vmem:[%s2144_s10 + $0x8] sm:$0xff]  ;;  %s1681_s27 = sadd.s32 1, %s2148_s14  ;;  %s1671_s16 = sadd.s32 1, %s2152_s16   ;;  %s2152_s16 = sphi %s2150_s16, %s1671_s16   ;;  %s2148_s14 = sphi %s2146_s14, %s2147_s14   ;;  %s2144_s10 = sphi %s2142_s10, %s1686_s10   ;;  %s2140_s29 = sphi %s2138_s29, %s1687_s29  }
 0x412   : >> { %1678 = vst [vmem:[%s2140_s29] sm:$0xff] %v1677_v48  ;;  %1680 = vst [vmem:[%s2140_s29 + $0x8] sm:$0xff] %v1679_v45  ;;  %p1682_p0 = scmp.ge.s32.totalorder %s1681_s27, %s3175_s21  ;;  %p1670_p1 = scmp.ge.s32.totalorder %s1671_s16, %s3175_s21 }
 0x414   : >> { %s3220_s27 = smov (%p1682_p0, %s1681_s27), 0  ;;  %1673 = sbr.rel (!%p1670_p1) target bundleno = 1041 (0x411), region = 134 }
 0x415   : >> { %s1865_s23 = sshll.u32 %s3220_s27, 4  ;;  %s2147_s14 = smov %s3220_s27  }
 0x416   : >> { %s1686_s10 = scalar_lea.vmem %s3179_s26, %s1865_s23 [#allocation2]   ;;  %s1687_s29 = scalar_lea.vmem %s1667_s24, %s1865_s23  }
 0x419 PF: > { %p15_p2 = scmp.ge.s32.totalorder %s2216_s9, 4   ;;  %s3212_s27 = smov %s2116_s28 }
 0x41a   : > { %s3213_s28 = smov %s2224_s12  ;;  %s3214_s29 = smov %s2216_s9 }
 0x41b   :  { %17 = sbr.rel (!%p15_p2) target bundleno = 2 (0x2), region = 145 }

</bundles_post_ra>
